<compile_context>
chip_gen: v6e
topology: v6e:2x2x1
jax: 0.10.0
libtpu: 0.0.40
codegen_flags: <defaults>
</compile_context>

<pallas_src>
import functools

import jax
import jax.numpy as jnp
from jax.experimental import pallas as pl
from jax.experimental.pallas import tpu as pltpu

SELU_ALPHA = 1.6732632423543772848170429916717
SELU_SCALE = 1.0507009873554804934193349852946
LN_EPS = 1e-9


def _round_up(x, m):
    return (x + m - 1) // m * m


def _selu(x):
    # exp only on the non-positive branch to stay overflow-safe.
    return SELU_SCALE * jnp.where(
        x > 0, x, SELU_ALPHA * (jnp.exp(jnp.minimum(x, 0.0)) - 1.0))


# ---------------------------------------------------------------------------
# Epilogues (run once, in the finalize pl.when, on the f32 accumulator + bias)
# ---------------------------------------------------------------------------

def _epilogue_linear(y, extras, cout):
    del extras, cout
    return y


def _epilogue_selu(y, extras, cout):
    del extras, cout
    return _selu(y)


def _epilogue_tanh(y, extras, cout):
    del extras, cout
    return jnp.tanh(y)


def _epilogue_selu_ln(y, extras, cout):
    # SELU followed by channel LayerNormal: (x - mu) / (std + eps) * a_2 + b_2
    # (unbiased std, divisor cout-1, matching torch.std).  Channel stats are masked to the
    # real `cout` channels because the lane dim is padded to a multiple of 128.
    a2, b2 = extras
    y = _selu(y)
    lane = jax.lax.broadcasted_iota(jnp.int32, y.shape, 1)
    mask = (lane < cout).astype(y.dtype)
    mu = jnp.sum(y * mask, axis=-1, keepdims=True) * (1.0 / cout)
    d = (y - mu) * mask
    var = jnp.sum(d * d, axis=-1, keepdims=True) * (1.0 / (cout - 1))
    # rsqrt(var + eps) rides the EUP slot; for eps=1e-9 the difference vs 1/(std+eps)
    # is below f32 resolution for non-degenerate rows.
    scale = a2 * jax.lax.rsqrt(var + LN_EPS)
    return (y - mu) * scale + b2
    # TODO(synk): Dropout2d(0.2) in training mode is stochastic (PyTorch RNG); identity
    # (eval-mode semantics) here.


# ---------------------------------------------------------------------------
# Tiled matmul + fused epilogue Pallas kernel
# ---------------------------------------------------------------------------

def _make_matmul_kernel(epilogue, cout, num_extras):
    """kernel(x, w, bias, *extras, out, acc): K-tiled matmul with fused epilogue."""

    def kernel(*refs):
        x_ref, w_ref, b_ref = refs[:3]
        extra_refs = refs[3:3 + num_extras]
        o_ref = refs[3 + num_extras]
        acc_ref = refs[4 + num_extras]

        k_idx = pl.program_id(1)

        @pl.when(k_idx == 0)
        def _init():
            acc_ref[...] = jnp.zeros_like(acc_ref)

        # bf16 operands, f32 accumulation on the MXU.
        acc_ref[...] += jnp.dot(x_ref[...], w_ref[...],
                                preferred_element_type=jnp.float32)

        @pl.when(k_idx == pl.num_programs(1) - 1)
        def _finalize():
            # Bias / scale / shift applied exactly once (no per-K broadcasts).
            y = acc_ref[...] + b_ref[...]
            extras = tuple(e[...] for e in extra_refs)
            o_ref[...] = epilogue(y, extras, cout).astype(o_ref.dtype)

    return kernel


def _matmul_epilogue(col, wmat, bias, extras, epilogue, cout):
    """col [M, K] f32, wmat [K, Cout] f32, bias/extras (Cout,). Returns [M, Cout] f32."""
    m, kk = col.shape

    coutp = _round_up(cout, 128)                      # lane-dense output
    tm = min(512, _round_up(m, 8))
    mp = _round_up(m, tm)
    tk = min(512, _round_up(kk, 128))
    kp = _round_up(kk, tk)

    col_p = jnp.pad(col, ((0, mp - m), (0, kp - kk))).astype(jnp.bfloat16)
    w_p = jnp.pad(wmat, ((0, kp - kk), (0, coutp - cout))).astype(jnp.bfloat16)
    b_p = jnp.pad(bias.astype(jnp.float32), (0, coutp - cout)).reshape(1, coutp)
    extra_p = [jnp.pad(e.astype(jnp.float32), (0, coutp - cout)).reshape(1, coutp)
               for e in extras]

    grid = (mp // tm, kp // tk)
    in_specs = [
        pl.BlockSpec((tm, tk), lambda i, k: (i, k)),
        pl.BlockSpec((tk, coutp), lambda i, k: (k, 0)),
        pl.BlockSpec((1, coutp), lambda i, k: (0, 0)),
    ]
    in_specs += [pl.BlockSpec((1, coutp), lambda i, k: (0, 0)) for _ in extra_p]

    cost = pl.CostEstimate(
        flops=2 * mp * kp * coutp,
        transcendentals=mp * coutp,
        bytes_accessed=(mp * kp + kp * coutp) * 2 + mp * coutp * 4,
    )

    out = pl.pallas_call(
        _make_matmul_kernel(epilogue, cout, len(extra_p)),
        grid=grid,
        out_shape=jax.ShapeDtypeStruct((mp, coutp), jnp.float32),
        in_specs=in_specs,
        out_specs=pl.BlockSpec((tm, coutp), lambda i, k: (i, 0)),
        scratch_shapes=[pltpu.VMEM((tm, coutp), jnp.float32)],
        compiler_params=pltpu.CompilerParams(
            dimension_semantics=("parallel", "arbitrary")),
        cost_estimate=cost,
    )(col_p, w_p, b_p, *extra_p)

    return out[:m, :cout]


# ---------------------------------------------------------------------------
# Conv / ConvTranspose wrappers (NHWC activations, no per-layer transposes)
# ---------------------------------------------------------------------------

def conv_layer(x, w, b, stride, pad, epilogue, extras=()):
    """x: NHWC [N,H,W,Cin];  w: [Cout,Cin,k,k] (PyTorch Conv2d layout);  b: [Cout]."""
    n, h, wid, cin = x.shape
    cout, _, k, _ = w.shape

    xp = jnp.pad(x, ((0, 0), (pad, pad), (pad, pad), (0, 0)))
    ho = (h + 2 * pad - k) // stride + 1
    wo = (wid + 2 * pad - k) // stride + 1

    # im2col with K ordered as (kh, kw, cin); XLA constant-folds/fuses the weight prep under jit.
    patches = []
    for kh in range(k):
        for kw in range(k):
            patches.append(xp[:, kh:kh + stride * ho:stride,
                              kw:kw + stride * wo:stride, :])
    col = jnp.concatenate(patches, axis=-1).reshape(n * ho * wo, k * k * cin)
    wmat = jnp.transpose(w, (2, 3, 1, 0)).reshape(k * k * cin, cout)

    out = _matmul_epilogue(col, wmat, b, extras, epilogue, cout)
    return out.reshape(n, ho, wo, cout)          # stay NHWC


def deconv_layer(x, w_t, b, stride, pad, epilogue, extras=()):
    """ConvTranspose2d as input-dilation + regular conv with flipped/transposed kernel.

    x: NHWC;  w_t: [Cin, Cout, k, k] (PyTorch ConvTranspose2d layout);  b: [Cout].
    """
    n, h, wid, c = x.shape
    k = w_t.shape[2]
    if stride > 1:
        hd = h * stride - (stride - 1)
        wd = wid * stride - (stride - 1)
        xd = jnp.zeros((n, hd, wd, c), x.dtype).at[:, ::stride, ::stride, :].set(x)
    else:
        xd = x
    w_conv = jnp.flip(jnp.transpose(w_t, (1, 0, 2, 3)), axis=(2, 3))  # [Cout,Cin,k,k]
    return conv_layer(xd, w_conv, b, stride=1, pad=k - 1 - pad,
                      epilogue=epilogue, extras=extras)


# ---------------------------------------------------------------------------
# mmdNetD forward = (encoder(x), decoder(encoder(x)))
# ---------------------------------------------------------------------------

def mmd_net_d_forward(x_nchw, params):
    # ---- encoder: DCGAN_D (SELU + LayerNormal middle blocks) ----
    h = jnp.transpose(x_nchw, (0, 2, 3, 1))          # single NCHW -> NHWC conversion
    enc = params["enc"]
    h = conv_layer(h, enc["w0"], enc["b0"], 2, 1, _epilogue_selu)
    for layer in enc["middle"]:
        h = conv_layer(h, layer["w"], layer["b"], 2, 1, _epilogue_selu_ln,
                       extras=(layer["a2"], layer["b2"]))
    h = conv_layer(h, enc["w_end"], enc["b_end"], 1, 0, _epilogue_linear)
    f_enc = jnp.mean(h, axis=(1, 2))                 # == view(b, out_dim, -1).mean(-1)

    # ---- decoder: DCGAN_G-style mirror consuming the encoder code ----
    dec = params["dec"]
    d = f_enc.reshape(f_enc.shape[0], 1, 1, f_enc.shape[1])   # NHWC 1x1 code
    d = deconv_layer(d, dec["w0"], dec["b0"], 1, 0, _epilogue_selu)
    for layer in dec["middle"]:
        d = deconv_layer(d, layer["w"], layer["b"], 2, 1, _epilogue_selu)
    d = deconv_layer(d, dec["w_end"], dec["b_end"], 2, 1, _epilogue_tanh)
    f_dec = jnp.transpose(d, (0, 3, 1, 2))           # back to NCHW for the output

    return f_enc, f_dec


# ---------------------------------------------------------------------------
# Deterministic parameter construction (mirrors the PyTorch __init__ shapes)
# ---------------------------------------------------------------------------

def init_params(key, input_size, num_chan, hid_dim, out_dim):
    def nrm(k, shape):
        return 0.02 * jax.random.normal(k, shape, jnp.float32)

    enc = {}
    key, k1, k2 = jax.random.split(key, 3)
    enc["w0"] = nrm(k1, (hid_dim, num_chan, 4, 4))
    enc["b0"] = nrm(k2, (hid_dim,))

    middle = []
    size, mult = input_size // 2, 1
    while size > 4:
        cin, cout = hid_dim * mult, hid_dim * 2 * mult
        key, kw_, kb_ = jax.random.split(key, 3)
        middle.append({
            "w": nrm(kw_, (cout, cin, 4, 4)),
            "b": nrm(kb_, (cout,)),
            "a2": jnp.ones((cout,), jnp.float32),    # LayerNormal a_2
            "b2": jnp.zeros((cout,), jnp.float32),   # LayerNormal b_2
        })
        size //= 2
        mult *= 2
    enc["middle"] = middle

    key, kw_, kb_ = jax.random.split(key, 3)
    enc["w_end"] = nrm(kw_, (out_dim, hid_dim * mult, 4, 4))
    enc["b_end"] = nrm(kb_, (out_dim,))

    # decoder mirrors the encoder channel schedule in reverse (ConvTranspose2d weights [Cin,Cout,k,k])
    dec = {}
    key, kw_, kb_ = jax.random.split(key, 3)
    dec["w0"] = nrm(kw_, (out_dim, hid_dim * mult, 4, 4))
    dec["b0"] = nrm(kb_, (hid_dim * mult,))
    dmid = []
    m = mult
    while m > 1:
        cin, cout = hid_dim * m, hid_dim * m // 2
        key, kw_, kb_ = jax.random.split(key, 3)
        dmid.append({"w": nrm(kw_, (cin, cout, 4, 4)), "b": nrm(kb_, (cout,))})
        m //= 2
    dec["middle"] = dmid
    key, kw_, kb_ = jax.random.split(key, 3)
    dec["w_end"] = nrm(kw_, (hid_dim, num_chan, 4, 4))
    dec["b_end"] = nrm(kb_, (num_chan,))

    return {"enc": enc, "dec": dec}


if __name__ == "__main__":
    input_size, num_chan, hid_dim, out_dim, batch = 16, 4, 8, 8, 2

    key = jax.random.PRNGKey(0)
    kx, kp = jax.random.split(key)
    x = jax.random.normal(kx, (batch, num_chan, input_size, input_size), jnp.float32)
    params = init_params(kp, input_size, num_chan, hid_dim, out_dim)

    fwd = jax.jit(mmd_net_d_forward)
    f_enc, f_dec = fwd(x, params)
    f_enc = jax.block_until_ready(f_enc)
    f_dec = jax.block_until_ready(f_dec)

    assert f_enc.shape == (batch, out_dim), f_enc.shape
    assert f_dec.shape == (batch, num_chan, input_size, input_size), f_dec.shape
    assert bool(jnp.all(jnp.isfinite(f_enc)))
    assert bool(jnp.all(jnp.isfinite(f_dec)))
    print("KERNEL_OK")
</pallas_src>

<mosaic_0001>
module attributes {stable_mosaic.version = 11 : i64} {
  func.func @kernel(%arg0: i32, %arg1: i32, %arg2: memref<128x128xbf16, #tpu.memory_space<vmem>>, %arg3: memref<128x128xbf16, #tpu.memory_space<vmem>>, %arg4: memref<1x128xf32, #tpu.memory_space<vmem>>, %arg5: memref<128x128xf32, #tpu.memory_space<vmem>>, %arg6: memref<128x128xf32, #tpu.memory_space<vmem>>) attributes {dimension_semantics = [#tpu.dimension_semantics<parallel>, #tpu.dimension_semantics<arbitrary>], iteration_bounds = array<i64: 1, 1>, scalar_prefetch = 0 : i64, scratch_operands = 1 : i64, tpu.core_type = #tpu.core_type<tc>, window_params = [{transform_indices = @transform_0, window_bounds = array<i64: 128, 128>}, {transform_indices = @transform_1, window_bounds = array<i64: 128, 128>}, {pipeline_mode = #tpu.pipeline_mode<synchronous>, transform_indices = @transform_2, window_bounds = array<i64: 1, 128>}, {transform_indices = @transform_3, window_bounds = array<i64: 128, 128>}]} {
    %c0_i32 = arith.constant 0 : i32
    %0 = arith.cmpi eq, %arg1, %c0_i32 : i32
    %1 = arith.extui %0 : i1 to i32
    %c0_i32_0 = arith.constant 0 : i32
    %2 = arith.cmpi ne, %1, %c0_i32_0 : i32
    scf.if %2 {
      %cst_10 = arith.constant 0.000000e+00 : f32
      %12 = vector.broadcast %cst_10 : f32 to vector<128x128xf32>
      %c0_11 = arith.constant 0 : index
      %c0_12 = arith.constant 0 : index
      %13 = vector.load %arg6[%c0_11, %c0_12] : memref<128x128xf32, #tpu.memory_space<vmem>>, vector<128x128xf32>
      tpu.vector_store %arg6[%c0_11, %c0_12], %12 {strides = array<i32>} : memref<128x128xf32, #tpu.memory_space<vmem>>, vector<128x128xf32>,
    } else {
    }
    %c0 = arith.constant 0 : index
    %c0_1 = arith.constant 0 : index
    %3 = vector.load %arg6[%c0, %c0_1] : memref<128x128xf32, #tpu.memory_space<vmem>>, vector<128x128xf32>
    %c0_2 = arith.constant 0 : index
    %c0_3 = arith.constant 0 : index
    %4 = vector.load %arg2[%c0_2, %c0_3] : memref<128x128xbf16, #tpu.memory_space<vmem>>, vector<128x128xbf16>
    %c0_4 = arith.constant 0 : index
    %c0_5 = arith.constant 0 : index
    %5 = vector.load %arg3[%c0_4, %c0_5] : memref<128x128xbf16, #tpu.memory_space<vmem>>, vector<128x128xbf16>
    %cst = arith.constant dense<0.000000e+00> : vector<128x128xf32>
    %6 = tpu.matmul %4, %5, %cst {dimension_numbers = #tpu.dot_dimension_numbers<[1], [0], [0], [1], [0, 0, 1, 1], [], []>} : vector<128x128xbf16>, vector<128x128xbf16>, vector<128x128xf32> -> vector<128x128xf32>
    %7 = arith.addf %3, %6 : vector<128x128xf32>
    %c0_6 = arith.constant 0 : index
    %c0_7 = arith.constant 0 : index
    %8 = vector.load %arg6[%c0_6, %c0_7] : memref<128x128xf32, #tpu.memory_space<vmem>>, vector<128x128xf32>
    tpu.vector_store %arg6[%c0_6, %c0_7], %7 {strides = array<i32>} : memref<128x128xf32, #tpu.memory_space<vmem>>, vector<128x128xf32>,
    %c0_i32_8 = arith.constant 0 : i32
    %9 = arith.cmpi eq, %arg1, %c0_i32_8 : i32
    %10 = arith.extui %9 : i1 to i32
    %c0_i32_9 = arith.constant 0 : i32
    %11 = arith.cmpi ne, %10, %c0_i32_9 : i32
    scf.if %11 {
      %c0_10 = arith.constant 0 : index
      %c0_11 = arith.constant 0 : index
      %12 = vector.load %arg6[%c0_10, %c0_11] : memref<128x128xf32, #tpu.memory_space<vmem>>, vector<128x128xf32>
      %c0_12 = arith.constant 0 : index
      %c0_13 = arith.constant 0 : index
      %13 = vector.load %arg4[%c0_12, %c0_13] : memref<1x128xf32, #tpu.memory_space<vmem>>, vector<1x128xf32>
      %14 = vector.broadcast %13 : vector<1x128xf32> to vector<128x128xf32>
      %15 = arith.addf %12, %14 : vector<128x128xf32>
      %cst_14 = arith.constant 0.000000e+00 : f32
      %16 = vector.broadcast %cst_14 : f32 to vector<128x128xf32>
      %17 = arith.cmpf ogt, %15, %16 : vector<128x128xf32>
      %cst_15 = arith.constant 0.000000e+00 : f32
      %18 = vector.broadcast %cst_15 : f32 to vector<128x128xf32>
      %19 = arith.minimumf %15, %18 : vector<128x128xf32>
      %20 = math.exp %19 : vector<128x128xf32>
      %cst_16 = arith.constant 1.000000e+00 : f32
      %21 = vector.broadcast %cst_16 : f32 to vector<128x128xf32>
      %22 = arith.subf %20, %21 : vector<128x128xf32>
      %cst_17 = arith.constant 1.67326319 : f32
      %23 = vector.broadcast %cst_17 : f32 to vector<128x128xf32>
      %24 = arith.mulf %23, %22 : vector<128x128xf32>
      %25 = arith.select %17, %15, %24 : vector<128x128xi1>, vector<128x128xf32>
      %cst_18 = arith.constant 1.05070102 : f32
      %26 = vector.broadcast %cst_18 : f32 to vector<128x128xf32>
      %27 = arith.mulf %26, %25 : vector<128x128xf32>
      %c0_19 = arith.constant 0 : index
      %c0_20 = arith.constant 0 : index
      %28 = vector.load %arg5[%c0_19, %c0_20] : memref<128x128xf32, #tpu.memory_space<vmem>>, vector<128x128xf32>
      tpu.vector_store %arg5[%c0_19, %c0_20], %27 {strides = array<i32>} : memref<128x128xf32, #tpu.memory_space<vmem>>, vector<128x128xf32>,
    } else {
    }
    return
  }
  func.func @transform_0(%arg0: i32, %arg1: i32) -> (i32, i32) {
    %c0_i32 = arith.constant 0 : i32
    return %arg0, %arg1 : i32, i32
  }
  func.func @transform_1(%arg0: i32, %arg1: i32) -> (i32, i32) {
    %c0_i32 = arith.constant 0 : i32
    %c0_i32_0 = arith.constant 0 : i32
    return %arg1, %c0_i32 : i32, i32
  }
  func.func @transform_2(%arg0: i32, %arg1: i32) -> (i32, i32) {
    %c0_i32 = arith.constant 0 : i32
    %c0_i32_0 = arith.constant 0 : i32
    %c0_i32_1 = arith.constant 0 : i32
    return %c0_i32, %c0_i32_0 : i32, i32
  }
  func.func @transform_3(%arg0: i32, %arg1: i32) -> (i32, i32) {
    %c0_i32 = arith.constant 0 : i32
    %c0_i32_0 = arith.constant 0 : i32
    return %arg0, %c0_i32 : i32, i32
  }
}

module attributes {stable_mosaic.version = 11 : i64} {
  func.func @kernel(%arg0: i32, %arg1: i32, %arg2: memref<32x128xbf16, #tpu.memory_space<vmem>>, %arg3: memref<128x128xbf16, #tpu.memory_space<vmem>>, %arg4: memref<1x128xf32, #tpu.memory_space<vmem>>, %arg5: memref<1x128xf32, #tpu.memory_space<vmem>>, %arg6: memref<1x128xf32, #tpu.memory_space<vmem>>, %arg7: memref<32x128xf32, #tpu.memory_space<vmem>>, %arg8: memref<32x128xf32, #tpu.memory_space<vmem>>) attributes {dimension_semantics = [#tpu.dimension_semantics<parallel>, #tpu.dimension_semantics<arbitrary>], iteration_bounds = array<i64: 1, 1>, scalar_prefetch = 0 : i64, scratch_operands = 1 : i64, tpu.core_type = #tpu.core_type<tc>, window_params = [{transform_indices = @transform_0, window_bounds = array<i64: 32, 128>}, {transform_indices = @transform_1, window_bounds = array<i64: 128, 128>}, {pipeline_mode = #tpu.pipeline_mode<synchronous>, transform_indices = @transform_2, window_bounds = array<i64: 1, 128>}, {pipeline_mode = #tpu.pipeline_mode<synchronous>, transform_indices = @transform_3, window_bounds = array<i64: 1, 128>}, {pipeline_mode = #tpu.pipeline_mode<synchronous>, transform_indices = @transform_4, window_bounds = array<i64: 1, 128>}, {transform_indices = @transform_5, window_bounds = array<i64: 32, 128>}]} {
    %c0_i32 = arith.constant 0 : i32
    %0 = arith.cmpi eq, %arg1, %c0_i32 : i32
    %1 = arith.extui %0 : i1 to i32
    %c0_i32_0 = arith.constant 0 : i32
    %2 = arith.cmpi ne, %1, %c0_i32_0 : i32
    scf.if %2 {
      %cst_10 = arith.constant 0.000000e+00 : f32
      %12 = vector.broadcast %cst_10 : f32 to vector<32x128xf32>
      %c0_11 = arith.constant 0 : index
      %c0_12 = arith.constant 0 : index
      %13 = vector.load %arg8[%c0_11, %c0_12] : memref<32x128xf32, #tpu.memory_space<vmem>>, vector<32x128xf32>
      tpu.vector_store %arg8[%c0_11, %c0_12], %12 {strides = array<i32>} : memref<32x128xf32, #tpu.memory_space<vmem>>, vector<32x128xf32>,
    } else {
    }
    %c0 = arith.constant 0 : index
    %c0_1 = arith.constant 0 : index
    %3 = vector.load %arg8[%c0, %c0_1] : memref<32x128xf32, #tpu.memory_space<vmem>>, vector<32x128xf32>
    %c0_2 = arith.constant 0 : index
    %c0_3 = arith.constant 0 : index
    %4 = vector.load %arg2[%c0_2, %c0_3] : memref<32x128xbf16, #tpu.memory_space<vmem>>, vector<32x128xbf16>
    %c0_4 = arith.constant 0 : index
    %c0_5 = arith.constant 0 : index
    %5 = vector.load %arg3[%c0_4, %c0_5] : memref<128x128xbf16, #tpu.memory_space<vmem>>, vector<128x128xbf16>
    %cst = arith.constant dense<0.000000e+00> : vector<32x128xf32>
    %6 = tpu.matmul %4, %5, %cst {dimension_numbers = #tpu.dot_dimension_numbers<[1], [0], [0], [1], [0, 0, 1, 1], [], []>} : vector<32x128xbf16>, vector<128x128xbf16>, vector<32x128xf32> -> vector<32x128xf32>
    %7 = arith.addf %3, %6 : vector<32x128xf32>
    %c0_6 = arith.constant 0 : index
    %c0_7 = arith.constant 0 : index
    %8 = vector.load %arg8[%c0_6, %c0_7] : memref<32x128xf32, #tpu.memory_space<vmem>>, vector<32x128xf32>
    tpu.vector_store %arg8[%c0_6, %c0_7], %7 {strides = array<i32>} : memref<32x128xf32, #tpu.memory_space<vmem>>, vector<32x128xf32>,
    %c0_i32_8 = arith.constant 0 : i32
    %9 = arith.cmpi eq, %arg1, %c0_i32_8 : i32
    %10 = arith.extui %9 : i1 to i32
    %c0_i32_9 = arith.constant 0 : i32
    %11 = arith.cmpi ne, %10, %c0_i32_9 : i32
    scf.if %11 {
      %c0_10 = arith.constant 0 : index
      %c0_11 = arith.constant 0 : index
      %12 = vector.load %arg8[%c0_10, %c0_11] : memref<32x128xf32, #tpu.memory_space<vmem>>, vector<32x128xf32>
      %c0_12 = arith.constant 0 : index
      %c0_13 = arith.constant 0 : index
      %13 = vector.load %arg4[%c0_12, %c0_13] : memref<1x128xf32, #tpu.memory_space<vmem>>, vector<1x128xf32>
      %14 = vector.broadcast %13 : vector<1x128xf32> to vector<32x128xf32>
      %15 = arith.addf %12, %14 : vector<32x128xf32>
      %c0_14 = arith.constant 0 : index
      %c0_15 = arith.constant 0 : index
      %16 = vector.load %arg5[%c0_14, %c0_15] : memref<1x128xf32, #tpu.memory_space<vmem>>, vector<1x128xf32>
      %c0_16 = arith.constant 0 : index
      %c0_17 = arith.constant 0 : index
      %17 = vector.load %arg6[%c0_16, %c0_17] : memref<1x128xf32, #tpu.memory_space<vmem>>, vector<1x128xf32>
      %cst_18 = arith.constant 0.000000e+00 : f32
      %18 = vector.broadcast %cst_18 : f32 to vector<32x128xf32>
      %19 = arith.cmpf ogt, %15, %18 : vector<32x128xf32>
      %cst_19 = arith.constant 0.000000e+00 : f32
      %20 = vector.broadcast %cst_19 : f32 to vector<32x128xf32>
      %21 = arith.minimumf %15, %20 : vector<32x128xf32>
      %22 = math.exp %21 : vector<32x128xf32>
      %cst_20 = arith.constant 1.000000e+00 : f32
      %23 = vector.broadcast %cst_20 : f32 to vector<32x128xf32>
      %24 = arith.subf %22, %23 : vector<32x128xf32>
      %cst_21 = arith.constant 1.67326319 : f32
      %25 = vector.broadcast %cst_21 : f32 to vector<32x128xf32>
      %26 = arith.mulf %25, %24 : vector<32x128xf32>
      %27 = arith.select %19, %15, %26 : vector<32x128xi1>, vector<32x128xf32>
      %cst_22 = arith.constant 1.05070102 : f32
      %28 = vector.broadcast %cst_22 : f32 to vector<32x128xf32>
      %29 = arith.mulf %28, %27 : vector<32x128xf32>
      %30 = tpu.iota {dimensions = array<i32: 1>} : vector<32x128xi32>
      %c16_i32 = arith.constant 16 : i32
      %31 = vector.broadcast %c16_i32 : i32 to vector<32x128xi32>
      %32 = arith.cmpi slt, %30, %31 : vector<32x128xi32>
      %33 = arith.extui %32 : vector<32x128xi1> to vector<32x128xi32>
      %34 = arith.sitofp %33 : vector<32x128xi32> to vector<32x128xf32>
      %35 = arith.mulf %29, %34 : vector<32x128xf32>
      %cst_23 = arith.constant dense<0.000000e+00> : vector<32xf32>
      %36 = vector.multi_reduction <add>, %35, %cst_23 [1] : vector<32x128xf32> to vector<32xf32>
      %37 = vector.shape_cast %36 : vector<32xf32> to vector<32x1xf32>
      %cst_24 = arith.constant 6.250000e-02 : f32
      %38 = vector.broadcast %cst_24 : f32 to vector<32x1xf32>
      %39 = arith.mulf %37, %38 : vector<32x1xf32>
      %40 = vector.broadcast %39 : vector<32x1xf32> to vector<32x128xf32>
      %41 = arith.subf %29, %40 : vector<32x128xf32>
      %42 = arith.mulf %41, %34 : vector<32x128xf32>
      %43 = arith.mulf %42, %42 : vector<32x128xf32>
      %cst_25 = arith.constant dense<0.000000e+00> : vector<32xf32>
      %44 = vector.multi_reduction <add>, %43, %cst_25 [1] : vector<32x128xf32> to vector<32xf32>
      %45 = vector.shape_cast %44 : vector<32xf32> to vector<32x1xf32>
      %cst_26 = arith.constant 0.0666666701 : f32
      %46 = vector.broadcast %cst_26 : f32 to vector<32x1xf32>
      %47 = arith.mulf %45, %46 : vector<32x1xf32>
      %cst_27 = arith.constant 9.99999971E-10 : f32
      %48 = vector.broadcast %cst_27 : f32 to vector<32x1xf32>
      %49 = arith.addf %47, %48 : vector<32x1xf32>
      %50 = math.rsqrt %49 : vector<32x1xf32>
      %51 = vector.broadcast %16 : vector<1x128xf32> to vector<32x128xf32>
      %52 = vector.broadcast %50 : vector<32x1xf32> to vector<32x128xf32>
      %53 = arith.mulf %51, %52 : vector<32x128xf32>
      %54 = vector.broadcast %39 : vector<32x1xf32> to vector<32x128xf32>
      %55 = arith.subf %29, %54 : vector<32x128xf32>
      %56 = arith.mulf %55, %53 : vector<32x128xf32>
      %57 = vector.broadcast %17 : vector<1x128xf32> to vector<32x128xf32>
      %58 = arith.addf %56, %57 : vector<32x128xf32>
      %c0_28 = arith.constant 0 : index
      %c0_29 = arith.constant 0 : index
      %59 = vector.load %arg7[%c0_28, %c0_29] : memref<32x128xf32, #tpu.memory_space<vmem>>, vector<32x128xf32>
      tpu.vector_store %arg7[%c0_28, %c0_29], %58 {strides = array<i32>} : memref<32x128xf32, #tpu.memory_space<vmem>>, vector<32x128xf32>,
    } else {
    }
    return
  }
  func.func @transform_0(%arg0: i32, %arg1: i32) -> (i32, i32) {
    %c0_i32 = arith.constant 0 : i32
    return %arg0, %arg1 : i32, i32
  }
  func.func @transform_1(%arg0: i32, %arg1: i32) -> (i32, i32) {
    %c0_i32 = arith.constant 0 : i32
    %c0_i32_0 = arith.constant 0 : i32
    return %arg1, %c0_i32 : i32, i32
  }
  func.func @transform_2(%arg0: i32, %arg1: i32) -> (i32, i32) {
    %c0_i32 = arith.constant 0 : i32
    %c0_i32_0 = arith.constant 0 : i32
    %c0_i32_1 = arith.constant 0 : i32
    return %c0_i32, %c0_i32_0 : i32, i32
  }
  func.func @transform_3(%arg0: i32, %arg1: i32) -> (i32, i32) {
    %c0_i32 = arith.constant 0 : i32
    %c0_i32_0 = arith.constant 0 : i32
    %c0_i32_1 = arith.constant 0 : i32
    return %c0_i32, %c0_i32_0 : i32, i32
  }
  func.func @transform_4(%arg0: i32, %arg1: i32) -> (i32, i32) {
    %c0_i32 = arith.constant 0 : i32
    %c0_i32_0 = arith.constant 0 : i32
    %c0_i32_1 = arith.constant 0 : i32
    return %c0_i32, %c0_i32_0 : i32, i32
  }
  func.func @transform_5(%arg0: i32, %arg1: i32) -> (i32, i32) {
    %c0_i32 = arith.constant 0 : i32
    %c0_i32_0 = arith.constant 0 : i32
    return %arg0, %c0_i32 : i32, i32
  }
}

module attributes {stable_mosaic.version = 11 : i64} {
  func.func @kernel(%arg0: i32, %arg1: i32, %arg2: memref<8x256xbf16, #tpu.memory_space<vmem>>, %arg3: memref<256x128xbf16, #tpu.memory_space<vmem>>, %arg4: memref<1x128xf32, #tpu.memory_space<vmem>>, %arg5: memref<8x128xf32, #tpu.memory_space<vmem>>, %arg6: memref<8x128xf32, #tpu.memory_space<vmem>>) attributes {dimension_semantics = [#tpu.dimension_semantics<parallel>, #tpu.dimension_semantics<arbitrary>], iteration_bounds = array<i64: 1, 1>, scalar_prefetch = 0 : i64, scratch_operands = 1 : i64, tpu.core_type = #tpu.core_type<tc>, window_params = [{transform_indices = @transform_0, window_bounds = array<i64: 8, 256>}, {transform_indices = @transform_1, window_bounds = array<i64: 256, 128>}, {pipeline_mode = #tpu.pipeline_mode<synchronous>, transform_indices = @transform_2, window_bounds = array<i64: 1, 128>}, {transform_indices = @transform_3, window_bounds = array<i64: 8, 128>}]} {
    %c0_i32 = arith.constant 0 : i32
    %0 = arith.cmpi eq, %arg1, %c0_i32 : i32
    %1 = arith.extui %0 : i1 to i32
    %c0_i32_0 = arith.constant 0 : i32
    %2 = arith.cmpi ne, %1, %c0_i32_0 : i32
    scf.if %2 {
      %cst_10 = arith.constant 0.000000e+00 : f32
      %12 = vector.broadcast %cst_10 : f32 to vector<8x128xf32>
      %c0_11 = arith.constant 0 : index
      %c0_12 = arith.constant 0 : index
      %13 = vector.load %arg6[%c0_11, %c0_12] : memref<8x128xf32, #tpu.memory_space<vmem>>, vector<8x128xf32>
      tpu.vector_store %arg6[%c0_11, %c0_12], %12 {strides = array<i32>} : memref<8x128xf32, #tpu.memory_space<vmem>>, vector<8x128xf32>,
    } else {
    }
    %c0 = arith.constant 0 : index
    %c0_1 = arith.constant 0 : index
    %3 = vector.load %arg6[%c0, %c0_1] : memref<8x128xf32, #tpu.memory_space<vmem>>, vector<8x128xf32>
    %c0_2 = arith.constant 0 : index
    %c0_3 = arith.constant 0 : index
    %4 = vector.load %arg2[%c0_2, %c0_3] : memref<8x256xbf16, #tpu.memory_space<vmem>>, vector<8x256xbf16>
    %c0_4 = arith.constant 0 : index
    %c0_5 = arith.constant 0 : index
    %5 = vector.load %arg3[%c0_4, %c0_5] : memref<256x128xbf16, #tpu.memory_space<vmem>>, vector<256x128xbf16>
    %cst = arith.constant dense<0.000000e+00> : vector<8x128xf32>
    %6 = tpu.matmul %4, %5, %cst {dimension_numbers = #tpu.dot_dimension_numbers<[1], [0], [0], [1], [0, 0, 1, 1], [], []>} : vector<8x256xbf16>, vector<256x128xbf16>, vector<8x128xf32> -> vector<8x128xf32>
    %7 = arith.addf %3, %6 : vector<8x128xf32>
    %c0_6 = arith.constant 0 : index
    %c0_7 = arith.constant 0 : index
    %8 = vector.load %arg6[%c0_6, %c0_7] : memref<8x128xf32, #tpu.memory_space<vmem>>, vector<8x128xf32>
    tpu.vector_store %arg6[%c0_6, %c0_7], %7 {strides = array<i32>} : memref<8x128xf32, #tpu.memory_space<vmem>>, vector<8x128xf32>,
    %c0_i32_8 = arith.constant 0 : i32
    %9 = arith.cmpi eq, %arg1, %c0_i32_8 : i32
    %10 = arith.extui %9 : i1 to i32
    %c0_i32_9 = arith.constant 0 : i32
    %11 = arith.cmpi ne, %10, %c0_i32_9 : i32
    scf.if %11 {
      %c0_10 = arith.constant 0 : index
      %c0_11 = arith.constant 0 : index
      %12 = vector.load %arg6[%c0_10, %c0_11] : memref<8x128xf32, #tpu.memory_space<vmem>>, vector<8x128xf32>
      %c0_12 = arith.constant 0 : index
      %c0_13 = arith.constant 0 : index
      %13 = vector.load %arg4[%c0_12, %c0_13] : memref<1x128xf32, #tpu.memory_space<vmem>>, vector<1x128xf32>
      %14 = vector.broadcast %13 : vector<1x128xf32> to vector<8x128xf32>
      %15 = arith.addf %12, %14 : vector<8x128xf32>
      %c0_14 = arith.constant 0 : index
      %c0_15 = arith.constant 0 : index
      %16 = vector.load %arg5[%c0_14, %c0_15] : memref<8x128xf32, #tpu.memory_space<vmem>>, vector<8x128xf32>
      tpu.vector_store %arg5[%c0_14, %c0_15], %15 {strides = array<i32>} : memref<8x128xf32, #tpu.memory_space<vmem>>, vector<8x128xf32>,
    } else {
    }
    return
  }
  func.func @transform_0(%arg0: i32, %arg1: i32) -> (i32, i32) {
    %c0_i32 = arith.constant 0 : i32
    return %arg0, %arg1 : i32, i32
  }
  func.func @transform_1(%arg0: i32, %arg1: i32) -> (i32, i32) {
    %c0_i32 = arith.constant 0 : i32
    %c0_i32_0 = arith.constant 0 : i32
    return %arg1, %c0_i32 : i32, i32
  }
  func.func @transform_2(%arg0: i32, %arg1: i32) -> (i32, i32) {
    %c0_i32 = arith.constant 0 : i32
    %c0_i32_0 = arith.constant 0 : i32
    %c0_i32_1 = arith.constant 0 : i32
    return %c0_i32, %c0_i32_0 : i32, i32
  }
  func.func @transform_3(%arg0: i32, %arg1: i32) -> (i32, i32) {
    %c0_i32 = arith.constant 0 : i32
    %c0_i32_0 = arith.constant 0 : i32
    return %arg0, %c0_i32 : i32, i32
  }
}

module attributes {stable_mosaic.version = 11 : i64} {
  func.func @kernel(%arg0: i32, %arg1: i32, %arg2: memref<32x128xbf16, #tpu.memory_space<vmem>>, %arg3: memref<128x128xbf16, #tpu.memory_space<vmem>>, %arg4: memref<1x128xf32, #tpu.memory_space<vmem>>, %arg5: memref<32x128xf32, #tpu.memory_space<vmem>>, %arg6: memref<32x128xf32, #tpu.memory_space<vmem>>) attributes {dimension_semantics = [#tpu.dimension_semantics<parallel>, #tpu.dimension_semantics<arbitrary>], iteration_bounds = array<i64: 1, 1>, scalar_prefetch = 0 : i64, scratch_operands = 1 : i64, tpu.core_type = #tpu.core_type<tc>, window_params = [{transform_indices = @transform_0, window_bounds = array<i64: 32, 128>}, {transform_indices = @transform_1, window_bounds = array<i64: 128, 128>}, {pipeline_mode = #tpu.pipeline_mode<synchronous>, transform_indices = @transform_2, window_bounds = array<i64: 1, 128>}, {transform_indices = @transform_3, window_bounds = array<i64: 32, 128>}]} {
    %c0_i32 = arith.constant 0 : i32
    %0 = arith.cmpi eq, %arg1, %c0_i32 : i32
    %1 = arith.extui %0 : i1 to i32
    %c0_i32_0 = arith.constant 0 : i32
    %2 = arith.cmpi ne, %1, %c0_i32_0 : i32
    scf.if %2 {
      %cst_10 = arith.constant 0.000000e+00 : f32
      %12 = vector.broadcast %cst_10 : f32 to vector<32x128xf32>
      %c0_11 = arith.constant 0 : index
      %c0_12 = arith.constant 0 : index
      %13 = vector.load %arg6[%c0_11, %c0_12] : memref<32x128xf32, #tpu.memory_space<vmem>>, vector<32x128xf32>
      tpu.vector_store %arg6[%c0_11, %c0_12], %12 {strides = array<i32>} : memref<32x128xf32, #tpu.memory_space<vmem>>, vector<32x128xf32>,
    } else {
    }
    %c0 = arith.constant 0 : index
    %c0_1 = arith.constant 0 : index
    %3 = vector.load %arg6[%c0, %c0_1] : memref<32x128xf32, #tpu.memory_space<vmem>>, vector<32x128xf32>
    %c0_2 = arith.constant 0 : index
    %c0_3 = arith.constant 0 : index
    %4 = vector.load %arg2[%c0_2, %c0_3] : memref<32x128xbf16, #tpu.memory_space<vmem>>, vector<32x128xbf16>
    %c0_4 = arith.constant 0 : index
    %c0_5 = arith.constant 0 : index
    %5 = vector.load %arg3[%c0_4, %c0_5] : memref<128x128xbf16, #tpu.memory_space<vmem>>, vector<128x128xbf16>
    %cst = arith.constant dense<0.000000e+00> : vector<32x128xf32>
    %6 = tpu.matmul %4, %5, %cst {dimension_numbers = #tpu.dot_dimension_numbers<[1], [0], [0], [1], [0, 0, 1, 1], [], []>} : vector<32x128xbf16>, vector<128x128xbf16>, vector<32x128xf32> -> vector<32x128xf32>
    %7 = arith.addf %3, %6 : vector<32x128xf32>
    %c0_6 = arith.constant 0 : index
    %c0_7 = arith.constant 0 : index
    %8 = vector.load %arg6[%c0_6, %c0_7] : memref<32x128xf32, #tpu.memory_space<vmem>>, vector<32x128xf32>
    tpu.vector_store %arg6[%c0_6, %c0_7], %7 {strides = array<i32>} : memref<32x128xf32, #tpu.memory_space<vmem>>, vector<32x128xf32>,
    %c0_i32_8 = arith.constant 0 : i32
    %9 = arith.cmpi eq, %arg1, %c0_i32_8 : i32
    %10 = arith.extui %9 : i1 to i32
    %c0_i32_9 = arith.constant 0 : i32
    %11 = arith.cmpi ne, %10, %c0_i32_9 : i32
    scf.if %11 {
      %c0_10 = arith.constant 0 : index
      %c0_11 = arith.constant 0 : index
      %12 = vector.load %arg6[%c0_10, %c0_11] : memref<32x128xf32, #tpu.memory_space<vmem>>, vector<32x128xf32>
      %c0_12 = arith.constant 0 : index
      %c0_13 = arith.constant 0 : index
      %13 = vector.load %arg4[%c0_12, %c0_13] : memref<1x128xf32, #tpu.memory_space<vmem>>, vector<1x128xf32>
      %14 = vector.broadcast %13 : vector<1x128xf32> to vector<32x128xf32>
      %15 = arith.addf %12, %14 : vector<32x128xf32>
      %cst_14 = arith.constant 0.000000e+00 : f32
      %16 = vector.broadcast %cst_14 : f32 to vector<32x128xf32>
      %17 = arith.cmpf ogt, %15, %16 : vector<32x128xf32>
      %cst_15 = arith.constant 0.000000e+00 : f32
      %18 = vector.broadcast %cst_15 : f32 to vector<32x128xf32>
      %19 = arith.minimumf %15, %18 : vector<32x128xf32>
      %20 = math.exp %19 : vector<32x128xf32>
      %cst_16 = arith.constant 1.000000e+00 : f32
      %21 = vector.broadcast %cst_16 : f32 to vector<32x128xf32>
      %22 = arith.subf %20, %21 : vector<32x128xf32>
      %cst_17 = arith.constant 1.67326319 : f32
      %23 = vector.broadcast %cst_17 : f32 to vector<32x128xf32>
      %24 = arith.mulf %23, %22 : vector<32x128xf32>
      %25 = arith.select %17, %15, %24 : vector<32x128xi1>, vector<32x128xf32>
      %cst_18 = arith.constant 1.05070102 : f32
      %26 = vector.broadcast %cst_18 : f32 to vector<32x128xf32>
      %27 = arith.mulf %26, %25 : vector<32x128xf32>
      %c0_19 = arith.constant 0 : index
      %c0_20 = arith.constant 0 : index
      %28 = vector.load %arg5[%c0_19, %c0_20] : memref<32x128xf32, #tpu.memory_space<vmem>>, vector<32x128xf32>
      tpu.vector_store %arg5[%c0_19, %c0_20], %27 {strides = array<i32>} : memref<32x128xf32, #tpu.memory_space<vmem>>, vector<32x128xf32>,
    } else {
    }
    return
  }
  func.func @transform_0(%arg0: i32, %arg1: i32) -> (i32, i32) {
    %c0_i32 = arith.constant 0 : i32
    return %arg0, %arg1 : i32, i32
  }
  func.func @transform_1(%arg0: i32, %arg1: i32) -> (i32, i32) {
    %c0_i32 = arith.constant 0 : i32
    %c0_i32_0 = arith.constant 0 : i32
    return %arg1, %c0_i32 : i32, i32
  }
  func.func @transform_2(%arg0: i32, %arg1: i32) -> (i32, i32) {
    %c0_i32 = arith.constant 0 : i32
    %c0_i32_0 = arith.constant 0 : i32
    %c0_i32_1 = arith.constant 0 : i32
    return %c0_i32, %c0_i32_0 : i32, i32
  }
  func.func @transform_3(%arg0: i32, %arg1: i32) -> (i32, i32) {
    %c0_i32 = arith.constant 0 : i32
    %c0_i32_0 = arith.constant 0 : i32
    return %arg0, %c0_i32 : i32, i32
  }
}

module attributes {stable_mosaic.version = 11 : i64} {
  func.func @kernel(%arg0: i32, %arg1: i32, %arg2: memref<128x256xbf16, #tpu.memory_space<vmem>>, %arg3: memref<256x128xbf16, #tpu.memory_space<vmem>>, %arg4: memref<1x128xf32, #tpu.memory_space<vmem>>, %arg5: memref<128x128xf32, #tpu.memory_space<vmem>>, %arg6: memref<128x128xf32, #tpu.memory_space<vmem>>) attributes {dimension_semantics = [#tpu.dimension_semantics<parallel>, #tpu.dimension_semantics<arbitrary>], iteration_bounds = array<i64: 1, 1>, scalar_prefetch = 0 : i64, scratch_operands = 1 : i64, tpu.core_type = #tpu.core_type<tc>, window_params = [{transform_indices = @transform_0, window_bounds = array<i64: 128, 256>}, {transform_indices = @transform_1, window_bounds = array<i64: 256, 128>}, {pipeline_mode = #tpu.pipeline_mode<synchronous>, transform_indices = @transform_2, window_bounds = array<i64: 1, 128>}, {transform_indices = @transform_3, window_bounds = array<i64: 128, 128>}]} {
    %c0_i32 = arith.constant 0 : i32
    %0 = arith.cmpi eq, %arg1, %c0_i32 : i32
    %1 = arith.extui %0 : i1 to i32
    %c0_i32_0 = arith.constant 0 : i32
    %2 = arith.cmpi ne, %1, %c0_i32_0 : i32
    scf.if %2 {
      %cst_10 = arith.constant 0.000000e+00 : f32
      %12 = vector.broadcast %cst_10 : f32 to vector<128x128xf32>
      %c0_11 = arith.constant 0 : index
      %c0_12 = arith.constant 0 : index
      %13 = vector.load %arg6[%c0_11, %c0_12] : memref<128x128xf32, #tpu.memory_space<vmem>>, vector<128x128xf32>
      tpu.vector_store %arg6[%c0_11, %c0_12], %12 {strides = array<i32>} : memref<128x128xf32, #tpu.memory_space<vmem>>, vector<128x128xf32>,
    } else {
    }
    %c0 = arith.constant 0 : index
    %c0_1 = arith.constant 0 : index
    %3 = vector.load %arg6[%c0, %c0_1] : memref<128x128xf32, #tpu.memory_space<vmem>>, vector<128x128xf32>
    %c0_2 = arith.constant 0 : index
    %c0_3 = arith.constant 0 : index
    %4 = vector.load %arg2[%c0_2, %c0_3] : memref<128x256xbf16, #tpu.memory_space<vmem>>, vector<128x256xbf16>
    %c0_4 = arith.constant 0 : index
    %c0_5 = arith.constant 0 : index
    %5 = vector.load %arg3[%c0_4, %c0_5] : memref<256x128xbf16, #tpu.memory_space<vmem>>, vector<256x128xbf16>
    %cst = arith.constant dense<0.000000e+00> : vector<128x128xf32>
    %6 = tpu.matmul %4, %5, %cst {dimension_numbers = #tpu.dot_dimension_numbers<[1], [0], [0], [1], [0, 0, 1, 1], [], []>} : vector<128x256xbf16>, vector<256x128xbf16>, vector<128x128xf32> -> vector<128x128xf32>
    %7 = arith.addf %3, %6 : vector<128x128xf32>
    %c0_6 = arith.constant 0 : index
    %c0_7 = arith.constant 0 : index
    %8 = vector.load %arg6[%c0_6, %c0_7] : memref<128x128xf32, #tpu.memory_space<vmem>>, vector<128x128xf32>
    tpu.vector_store %arg6[%c0_6, %c0_7], %7 {strides = array<i32>} : memref<128x128xf32, #tpu.memory_space<vmem>>, vector<128x128xf32>,
    %c0_i32_8 = arith.constant 0 : i32
    %9 = arith.cmpi eq, %arg1, %c0_i32_8 : i32
    %10 = arith.extui %9 : i1 to i32
    %c0_i32_9 = arith.constant 0 : i32
    %11 = arith.cmpi ne, %10, %c0_i32_9 : i32
    scf.if %11 {
      %c0_10 = arith.constant 0 : index
      %c0_11 = arith.constant 0 : index
      %12 = vector.load %arg6[%c0_10, %c0_11] : memref<128x128xf32, #tpu.memory_space<vmem>>, vector<128x128xf32>
      %c0_12 = arith.constant 0 : index
      %c0_13 = arith.constant 0 : index
      %13 = vector.load %arg4[%c0_12, %c0_13] : memref<1x128xf32, #tpu.memory_space<vmem>>, vector<1x128xf32>
      %14 = vector.broadcast %13 : vector<1x128xf32> to vector<128x128xf32>
      %15 = arith.addf %12, %14 : vector<128x128xf32>
      %cst_14 = arith.constant 0.000000e+00 : f32
      %16 = vector.broadcast %cst_14 : f32 to vector<128x128xf32>
      %17 = arith.cmpf ogt, %15, %16 : vector<128x128xf32>
      %cst_15 = arith.constant 0.000000e+00 : f32
      %18 = vector.broadcast %cst_15 : f32 to vector<128x128xf32>
      %19 = arith.minimumf %15, %18 : vector<128x128xf32>
      %20 = math.exp %19 : vector<128x128xf32>
      %cst_16 = arith.constant 1.000000e+00 : f32
      %21 = vector.broadcast %cst_16 : f32 to vector<128x128xf32>
      %22 = arith.subf %20, %21 : vector<128x128xf32>
      %cst_17 = arith.constant 1.67326319 : f32
      %23 = vector.broadcast %cst_17 : f32 to vector<128x128xf32>
      %24 = arith.mulf %23, %22 : vector<128x128xf32>
      %25 = arith.select %17, %15, %24 : vector<128x128xi1>, vector<128x128xf32>
      %cst_18 = arith.constant 1.05070102 : f32
      %26 = vector.broadcast %cst_18 : f32 to vector<128x128xf32>
      %27 = arith.mulf %26, %25 : vector<128x128xf32>
      %c0_19 = arith.constant 0 : index
      %c0_20 = arith.constant 0 : index
      %28 = vector.load %arg5[%c0_19, %c0_20] : memref<128x128xf32, #tpu.memory_space<vmem>>, vector<128x128xf32>
      tpu.vector_store %arg5[%c0_19, %c0_20], %27 {strides = array<i32>} : memref<128x128xf32, #tpu.memory_space<vmem>>, vector<128x128xf32>,
    } else {
    }
    return
  }
  func.func @transform_0(%arg0: i32, %arg1: i32) -> (i32, i32) {
    %c0_i32 = arith.constant 0 : i32
    return %arg0, %arg1 : i32, i32
  }
  func.func @transform_1(%arg0: i32, %arg1: i32) -> (i32, i32) {
    %c0_i32 = arith.constant 0 : i32
    %c0_i32_0 = arith.constant 0 : i32
    return %arg1, %c0_i32 : i32, i32
  }
  func.func @transform_2(%arg0: i32, %arg1: i32) -> (i32, i32) {
    %c0_i32 = arith.constant 0 : i32
    %c0_i32_0 = arith.constant 0 : i32
    %c0_i32_1 = arith.constant 0 : i32
    return %c0_i32, %c0_i32_0 : i32, i32
  }
  func.func @transform_3(%arg0: i32, %arg1: i32) -> (i32, i32) {
    %c0_i32 = arith.constant 0 : i32
    %c0_i32_0 = arith.constant 0 : i32
    return %arg0, %c0_i32 : i32, i32
  }
}

module attributes {stable_mosaic.version = 11 : i64} {
  func.func @kernel(%arg0: i32, %arg1: i32, %arg2: memref<512x128xbf16, #tpu.memory_space<vmem>>, %arg3: memref<128x128xbf16, #tpu.memory_space<vmem>>, %arg4: memref<1x128xf32, #tpu.memory_space<vmem>>, %arg5: memref<512x128xf32, #tpu.memory_space<vmem>>, %arg6: memref<512x128xf32, #tpu.memory_space<vmem>>) attributes {dimension_semantics = [#tpu.dimension_semantics<parallel>, #tpu.dimension_semantics<arbitrary>], iteration_bounds = array<i64: 1, 1>, scalar_prefetch = 0 : i64, scratch_operands = 1 : i64, tpu.core_type = #tpu.core_type<tc>, window_params = [{transform_indices = @transform_0, window_bounds = array<i64: 512, 128>}, {transform_indices = @transform_1, window_bounds = array<i64: 128, 128>}, {pipeline_mode = #tpu.pipeline_mode<synchronous>, transform_indices = @transform_2, window_bounds = array<i64: 1, 128>}, {transform_indices = @transform_3, window_bounds = array<i64: 512, 128>}]} {
    %c0_i32 = arith.constant 0 : i32
    %0 = arith.cmpi eq, %arg1, %c0_i32 : i32
    %1 = arith.extui %0 : i1 to i32
    %c0_i32_0 = arith.constant 0 : i32
    %2 = arith.cmpi ne, %1, %c0_i32_0 : i32
    scf.if %2 {
      %cst_10 = arith.constant 0.000000e+00 : f32
      %12 = vector.broadcast %cst_10 : f32 to vector<512x128xf32>
      %c0_11 = arith.constant 0 : index
      %c0_12 = arith.constant 0 : index
      %13 = vector.load %arg6[%c0_11, %c0_12] : memref<512x128xf32, #tpu.memory_space<vmem>>, vector<512x128xf32>
      tpu.vector_store %arg6[%c0_11, %c0_12], %12 {strides = array<i32>} : memref<512x128xf32, #tpu.memory_space<vmem>>, vector<512x128xf32>,
    } else {
    }
    %c0 = arith.constant 0 : index
    %c0_1 = arith.constant 0 : index
    %3 = vector.load %arg6[%c0, %c0_1] : memref<512x128xf32, #tpu.memory_space<vmem>>, vector<512x128xf32>
    %c0_2 = arith.constant 0 : index
    %c0_3 = arith.constant 0 : index
    %4 = vector.load %arg2[%c0_2, %c0_3] : memref<512x128xbf16, #tpu.memory_space<vmem>>, vector<512x128xbf16>
    %c0_4 = arith.constant 0 : index
    %c0_5 = arith.constant 0 : index
    %5 = vector.load %arg3[%c0_4, %c0_5] : memref<128x128xbf16, #tpu.memory_space<vmem>>, vector<128x128xbf16>
    %cst = arith.constant dense<0.000000e+00> : vector<512x128xf32>
    %6 = tpu.matmul %4, %5, %cst {dimension_numbers = #tpu.dot_dimension_numbers<[1], [0], [0], [1], [0, 0, 1, 1], [], []>} : vector<512x128xbf16>, vector<128x128xbf16>, vector<512x128xf32> -> vector<512x128xf32>
    %7 = arith.addf %3, %6 : vector<512x128xf32>
    %c0_6 = arith.constant 0 : index
    %c0_7 = arith.constant 0 : index
    %8 = vector.load %arg6[%c0_6, %c0_7] : memref<512x128xf32, #tpu.memory_space<vmem>>, vector<512x128xf32>
    tpu.vector_store %arg6[%c0_6, %c0_7], %7 {strides = array<i32>} : memref<512x128xf32, #tpu.memory_space<vmem>>, vector<512x128xf32>,
    %c0_i32_8 = arith.constant 0 : i32
    %9 = arith.cmpi eq, %arg1, %c0_i32_8 : i32
    %10 = arith.extui %9 : i1 to i32
    %c0_i32_9 = arith.constant 0 : i32
    %11 = arith.cmpi ne, %10, %c0_i32_9 : i32
    scf.if %11 {
      %c0_10 = arith.constant 0 : index
      %c0_11 = arith.constant 0 : index
      %12 = vector.load %arg6[%c0_10, %c0_11] : memref<512x128xf32, #tpu.memory_space<vmem>>, vector<512x128xf32>
      %c0_12 = arith.constant 0 : index
      %c0_13 = arith.constant 0 : index
      %13 = vector.load %arg4[%c0_12, %c0_13] : memref<1x128xf32, #tpu.memory_space<vmem>>, vector<1x128xf32>
      %14 = vector.broadcast %13 : vector<1x128xf32> to vector<512x128xf32>
      %15 = arith.addf %12, %14 : vector<512x128xf32>
      %16 = math.tanh %15 : vector<512x128xf32>
      %c0_14 = arith.constant 0 : index
      %c0_15 = arith.constant 0 : index
      %17 = vector.load %arg5[%c0_14, %c0_15] : memref<512x128xf32, #tpu.memory_space<vmem>>, vector<512x128xf32>
      tpu.vector_store %arg5[%c0_14, %c0_15], %16 {strides = array<i32>} : memref<512x128xf32, #tpu.memory_space<vmem>>, vector<512x128xf32>,
    } else {
    }
    return
  }
  func.func @transform_0(%arg0: i32, %arg1: i32) -> (i32, i32) {
    %c0_i32 = arith.constant 0 : i32
    return %arg0, %arg1 : i32, i32
  }
  func.func @transform_1(%arg0: i32, %arg1: i32) -> (i32, i32) {
    %c0_i32 = arith.constant 0 : i32
    %c0_i32_0 = arith.constant 0 : i32
    return %arg1, %c0_i32 : i32, i32
  }
  func.func @transform_2(%arg0: i32, %arg1: i32) -> (i32, i32) {
    %c0_i32 = arith.constant 0 : i32
    %c0_i32_0 = arith.constant 0 : i32
    %c0_i32_1 = arith.constant 0 : i32
    return %c0_i32, %c0_i32_0 : i32, i32
  }
  func.func @transform_3(%arg0: i32, %arg1: i32) -> (i32, i32) {
    %c0_i32 = arith.constant 0 : i32
    %c0_i32_0 = arith.constant 0 : i32
    return %arg0, %c0_i32 : i32, i32
  }
}

</mosaic_0001>

<bundles_post_ra>
// kernel: mmd_net_d_forward.6
= control target key start
LH: loop header
LB: loop body
LE: loop exit
PB: predicated region body
PF: predicated region fallthrough
CT: control target
= control target key end

     0   :  { %s860_s1 = inlined_call_operand.vmem [shape: bf16[128,128], index: 1, kind: input, shape index: {}]   ;;  %s861_s0 = inlined_call_operand.vmem [shape: bf16[128,128], index: 0, kind: input, shape index: {}]   ;;  %s862_s2 = inlined_call_operand.vmem [shape: f32[1,128], index: 2, kind: input, shape index: {}]   ;;  %s863_s3 = inlined_call_operand.vmem [shape: f32[128,128], index: 3, kind: output, shape index: {}]  }
   0x1   :  { %v595_v0 = vld [vmem:[%s860_s1 + $0x38] sm:$0xff]   ;;  %v596_v1 = vld [vmem:[%s860_s1 + $0x30] sm:$0xff]   ;;  %v597_v2 = vld [vmem:[%s860_s1 + $0x28] sm:$0xff]  }
   0x2   :  { %547 = vmatprep.subr.bf16.mxu0 %v595_v0  ;;  %579 = vmatprep.subr.bf16.mxu1 %v595_v0  ;;  %v598_v3 = vld [vmem:[%s860_s1 + $0x20] sm:$0xff]   ;;  %v599_v6 = vld [vmem:[%s860_s1 + $0x18] sm:$0xff]   ;;  %v600_v7 = vld [vmem:[%s860_s1 + $0x10] sm:$0xff]  }
   0x3   :  { %548 = vmatpush3.bf16.msra.mxu0 %v595_v0  ;;  %587 = vmatpush3.bf16.msra.mxu1 %v595_v0  ;;  %v603_v4 = vld [vmem:[%s861_s0] sm:$0xff]   ;;  %v601_v8 = vld [vmem:[%s860_s1 + $0x8] sm:$0xff]   ;;  %v607_v12 = vld [vmem:[%s861_s0 + $0x10] sm:$0xff]  }
   0x4   :  { %549 = vmatprep.subr.bf16.mxu0 %v596_v1  ;;  %580 = vmatprep.subr.bf16.mxu1 %v596_v1  ;;  %v604_v5 = vld [vmem:[%s861_s0 + $0x20] sm:$0xff]   ;;  %v605_v10 = vld [vmem:[%s861_s0 + $0x8] sm:$0xff]   ;;  %v608_v13 = vld [vmem:[%s861_s0 + $0x30] sm:$0xff]  }
   0x5   :  { %563 = vmatprep.mubr.bf16.mxu0 %v603_v4  ;;  %571 = vmatprep.mubr.bf16.mxu1 %v604_v5  ;;  %v602_v9 = vld [vmem:[%s860_s1] sm:$0xff]   ;;  %v606_v11 = vld [vmem:[%s861_s0 + $0x28] sm:$0xff]   ;;  %v609_v14 = vld [vmem:[%s861_s0 + $0x18] sm:$0xff]  }
   0x6   :  { %v610_v15 = vld [vmem:[%s861_s0 + $0x38] sm:$0xff]   ;;  %v714_v16 = vld [vmem:[%s862_s2] ss:$0 sm:$0xff] }
   0x7   :  { %550 = vmatpush3.bf16.msra.mxu0 %v596_v1  ;;  %588 = vmatpush3.bf16.msra.mxu1 %v596_v1 }
   0x8   :  { %551 = vmatprep.subr.bf16.mxu0 %v597_v2  ;;  %581 = vmatprep.subr.bf16.mxu1 %v597_v2 }
   0xb   :  { %552 = vmatpush3.bf16.msra.mxu0 %v597_v2  ;;  %589 = vmatpush3.bf16.msra.mxu1 %v597_v2 }
   0xc   :  { %553 = vmatprep.subr.bf16.mxu0 %v598_v3  ;;  %582 = vmatprep.subr.bf16.mxu1 %v598_v3 }
   0xf   :  { %554 = vmatpush3.bf16.msra.mxu0 %v598_v3  ;;  %590 = vmatpush3.bf16.msra.mxu1 %v598_v3 }
  0x10   :  { %555 = vmatprep.subr.bf16.mxu0 %v599_v6  ;;  %583 = vmatprep.subr.bf16.mxu1 %v599_v6 }
  0x13   :  { %556 = vmatpush3.bf16.msra.mxu0 %v599_v6  ;;  %591 = vmatpush3.bf16.msra.mxu1 %v599_v6 }
  0x14   :  { %557 = vmatprep.subr.bf16.mxu0 %v600_v7  ;;  %584 = vmatprep.subr.bf16.mxu1 %v600_v7 }
  0x17   :  { %558 = vmatpush3.bf16.msra.mxu0 %v600_v7  ;;  %592 = vmatpush3.bf16.msra.mxu1 %v600_v7 }
  0x18   :  { %559 = vmatprep.subr.bf16.mxu0 %v601_v8  ;;  %585 = vmatprep.subr.bf16.mxu1 %v601_v8 }
  0x1b   :  { %560 = vmatpush3.bf16.msra.mxu0 %v601_v8  ;;  %593 = vmatpush3.bf16.msra.mxu1 %v601_v8 }
  0x1c   :  { %561 = vmatprep.subr.bf16.mxu0 %v602_v9  ;;  %586 = vmatprep.subr.bf16.mxu1 %v602_v9 }
  0x1f   :  { %562 = vmatpush3.bf16.msra.mxu0 %v602_v9  ;;  %594 = vmatpush3.bf16.msra.mxu1 %v602_v9 }
  0x22   :  { %564 = vmatmul.mubr.bf16.vlgmr.msra.gmra.mxu0 %v605_v10  ;;  %572 = vmatmul.mubr.bf16.vlgmr.msra.gmra.mxu1 %v606_v11 }
  0x23   :  { %567 = vmatprep.mubr.bf16.mxu0 %v607_v12  ;;  %575 = vmatprep.mubr.bf16.mxu1 %v608_v13 }
  0x2a   :  { %568 = vmatmul.mubr.bf16.gmra.mxu0 %v609_v14  ;;  %576 = vmatmul.mubr.bf16.gmra.mxu1 %v610_v15 }
  0xe2   :  { %v565_v17 = vpop.f32.mrf.mxu0  ;;  %v573_v18 = vpop.f32.mrf.mxu1 }
  0xe3   :  { %v717_v19 = vadd.f32 %v565_v17, %v714_v16  ;;  %v720_v20 = vadd.f32 %v573_v18, %v714_v16 }
  0xe4   :  { %v213_v21 = vpop.f32.mrf.mxu0  ;;  %v245_v22 = vpop.f32.mrf.mxu1 }
  0xe5   :  { %v368_v23 = vmin.f32 %v717_v19, 0.0  ;;  %v376_v24 = vmin.f32 %v720_v20, 0.0  ;;  %v725_v25 = vadd.f32 %v714_v16, %v213_v21  ;;  %v728_v26 = vadd.f32 %v714_v16, %v245_v22 }
  0xe6   :  { %v566_v27 = vpop.f32.mrf.mxu0  ;;  %v574_v28 = vpop.f32.mrf.mxu1  ;;  %vm352_vm0 = vcmp.gt.f32.partialorder %v717_v19, 0.0  ;;  %vm360_vm1 = vcmp.gt.f32.partialorder %v720_v20, 0.0 }
  0xe7   :  { %v386_v29 = vmul.f32 1.442695, %v368_v23  ;;  %v402_v30 = vmul.f32 1.442695, %v376_v24  ;;  %v731_v31 = vadd.f32 %v566_v27, %v714_v16  ;;  %v734_v32 = vadd.f32 %v574_v28, %v714_v16 }
  0xe8   :  { %v366_v33 = vmin.f32 %v725_v25, 0.0  ;;  %v374_v34 = vmin.f32 %v728_v26, 0.0  ;;  %v216_v35 = vpop.f32.mrf.mxu0  ;;  %v248_v36 = vpop.f32.mrf.mxu1  ;;  %vm350_vm2 = vcmp.gt.f32.partialorder %v725_v25, 0.0  ;;  %vm358_vm3 = vcmp.gt.f32.partialorder %v728_v26, 0.0 }
  0xe9   :  { %611 = vpow2.f32 %v386_v29  ;;  %v369_v37 = vmin.f32 %v731_v31, 0.0  ;;  %v377_v40 = vmin.f32 %v734_v32, 0.0  ;;  %v741_v44 = vadd.f32 %v714_v16, %v216_v35 }
  0xea   :  { %613 = vpow2.f32 %v402_v30  ;;  %v382_v38 = vmul.f32 1.442695, %v366_v33  ;;  %v398_v39 = vmul.f32 1.442695, %v374_v34  ;;  %v569_v41 = vpop.f32.mrf.mxu0  ;;  %v577_v42 = vpop.f32.mrf.mxu1  ;;  %v744_v45 = vadd.f32 %v714_v16, %v248_v36 }
  0xeb   :  { %v388_v43 = vmul.f32 1.442695, %v369_v37  ;;  %v747_v46 = vadd.f32 %v569_v41, %v714_v16  ;;  %v404_v47 = vmul.f32 1.442695, %v377_v40  ;;  %v750_v48 = vadd.f32 %v577_v42, %v714_v16 }
  0xec   :  { %615 = vpow2.f32 %v382_v38  ;;  %v229_v49 = vpop.f32.mrf.mxu0  ;;  %v261_v50 = vpop.f32.mrf.mxu1  ;;  %v367_v51 = vmin.f32 %v741_v44, 0.0  ;;  %v375_v52 = vmin.f32 %v744_v45, 0.0  ;;  %vm353_vm4 = vcmp.gt.f32.partialorder %v731_v31, 0.0 }
  0xed   :  { %617 = vpow2.f32 %v398_v39  ;;  %v372_v53 = vmin.f32 %v747_v46, 0.0  ;;  %v380_v57 = vmin.f32 %v750_v48, 0.0  ;;  %v757_v60 = vadd.f32 %v714_v16, %v229_v49 }
  0xee   :  { %619 = vpow2.f32 %v388_v43  ;;  %v570_v54 = vpop.f32.mrf.mxu0  ;;  %v578_v55 = vpop.f32.mrf.mxu1  ;;  %v384_v56 = vmul.f32 1.442695, %v367_v51  ;;  %v400_v58 = vmul.f32 1.442695, %v375_v52  ;;  %v760_v61 = vadd.f32 %v714_v16, %v261_v50 }
  0xef   :  { %621 = vpow2.f32 %v404_v47  ;;  %v394_v59 = vmul.f32 1.442695, %v372_v53  ;;  %v410_v62 = vmul.f32 1.442695, %v380_v57  ;;  %v763_v63 = vadd.f32 %v570_v54, %v714_v16 }
  0xf0   :  { %623 = vpow2.f32 %v384_v56  ;;  %v766_v0 = vadd.f32 %v578_v55, %v714_v16  ;;  %v370_v1 = vmin.f32 %v757_v60, 0.0  ;;  %v232_v2 = vpop.f32.mrf.mxu0  ;;  %v264_v3 = vpop.f32.mrf.mxu1  ;;  %v378_v4 = vmin.f32 %v760_v61, 0.0 }
  0xf1   :  { %625 = vpow2.f32 %v400_v58  ;;  %v373_v5 = vmin.f32 %v763_v63, 0.0  ;;  %v773_v10 = vadd.f32 %v714_v16, %v232_v2  ;;  %v776_v11 = vadd.f32 %v714_v16, %v264_v3 }
  0xf2   :  { %627 = vpow2.f32 %v394_v59  ;;  %v390_v6 = vmul.f32 1.442695, %v370_v1  ;;  %v381_v7 = vmin.f32 %v766_v0, 0.0  ;;  %v406_v8 = vmul.f32 1.442695, %v378_v4 }
  0xf3   :  { %629 = vpow2.f32 %v410_v62  ;;  %v396_v9 = vmul.f32 1.442695, %v373_v5  ;;  %v371_v17 = vmin.f32 %v773_v10, 0.0  ;;  %v379_v21 = vmin.f32 %v776_v11, 0.0 }
  0xf4   :  { %631 = vpow2.f32 %v390_v6  ;;  %v412_v13 = vmul.f32 1.442695, %v381_v7  ;;  %vm361_vm5 = vcmp.gt.f32.partialorder %v734_v32, 0.0  ;;  %vm351_vm6 = vcmp.gt.f32.partialorder %v741_v44, 0.0 }
  0xf5   :  { %633 = vpow2.f32 %v406_v8  ;;  %v392_v24 = vmul.f32 1.442695, %v371_v17  ;;  %v408_v29 = vmul.f32 1.442695, %v379_v21  ;;  %vm359_vm7 = vcmp.gt.f32.partialorder %v744_v45, 0.0 }
  0xf6   :  { %v612_v12 = vpop.eup %611  ;;  %635 = vpow2.f32 %v396_v9  ;;  %vm356_vm8 = vcmp.gt.f32.partialorder %v747_v46, 0.0  ;;  %vm364_vm9 = vcmp.gt.f32.partialorder %v750_v48, 0.0  ;;  %vm354_vm10 = vcmp.gt.f32.partialorder %v757_v60, 0.0 }
  0xf7   :  { %v614_v14 = vpop.eup %613  ;;  %v517_v15 = vadd.f32 -1.0, %v612_v12  ;;  %637 = vpow2.f32 %v412_v13  ;;  %vm362_vm11 = vcmp.gt.f32.partialorder %v760_v61, 0.0  ;;  %vm357_vm12 = vcmp.gt.f32.partialorder %v763_v63, 0.0 }
  0xf8   :  { %v525_v18 = vadd.f32 -1.0, %v614_v14  ;;  %639 = vpow2.f32 %v392_v24  ;;  %vm365_vm13 = vcmp.gt.f32.partialorder %v766_v0, 0.0  ;;  %vm355_vm14 = vcmp.gt.f32.partialorder %v773_v10, 0.0 }
  0xf9   :  { %v616_v22 = vpop.eup %615  ;;  %v432_v23 = vmul.f32 1.6732632, %v517_v15  ;;  %641 = vpow2.f32 %v408_v29  ;;  %vm363_vm15 = vcmp.gt.f32.partialorder %v776_v11, 0.0 }
  0xfa   :  { %v618_v16 = vpop.eup %617  ;;  %v440_v27 = vmul.f32 1.6732632, %v525_v18  ;;  %v515_v28 = vadd.f32 -1.0, %v616_v22 }
  0xfb   :  { %v620_v30 = vpop.eup %619  ;;  %v448_v33 = vsel %vm352_vm0, %v717_v19, %v432_v23  ;;  %v523_v34 = vadd.f32 -1.0, %v618_v16 }
  0xfc   :  { %v622_v35 = vpop.eup %621  ;;  %v464_v36 = vmul.f32 1.050701, %v448_v33  ;;  %v456_v37 = vsel %vm360_vm1, %v720_v20, %v440_v27  ;;  %v430_v38 = vmul.f32 1.6732632, %v515_v28  ;;  %v518_v39 = vadd.f32 -1.0, %v620_v30 }
  0xfd   :  { %v472_v40 = vmul.f32 1.050701, %v456_v37  ;;  %v438_v41 = vmul.f32 1.6732632, %v523_v34  ;;  %v526_v42 = vadd.f32 -1.0, %v622_v35  ;;  %v624_v43 = vpop.eup %623 }
  0xfe   :  { %480 = vst [vmem:[%s863_s3 + $0x10] sm:$0xff] %v464_v36  ;;  %v446_v19 = vsel %vm350_vm2, %v725_v25, %v430_v38  ;;  %v433_v47 = vmul.f32 1.6732632, %v518_v39  ;;  %v626_v49 = vpop.eup %625  ;;  %v516_v52 = vadd.f32 -1.0, %v624_v43 }
  0xff   :  { %488 = vst [vmem:[%s863_s3 + $0x50] sm:$0xff] %v472_v40  ;;  %v462_v20 = vmul.f32 1.050701, %v446_v19  ;;  %v454_v50 = vsel %vm358_vm3, %v728_v26, %v438_v41  ;;  %v441_v51 = vmul.f32 1.6732632, %v526_v42  ;;  %v628_v53 = vpop.eup %627  ;;  %v524_v25 = vadd.f32 -1.0, %v626_v49 }
 0x100   :  { %v470_v54 = vmul.f32 1.050701, %v454_v50  ;;  %v449_v55 = vsel %vm353_vm4, %v731_v31, %v433_v47  ;;  %v630_v56 = vpop.eup %629  ;;  %v431_v59 = vmul.f32 1.6732632, %v516_v52  ;;  %v521_v62 = vadd.f32 -1.0, %v628_v53 }
 0x101   :  { %478 = vst [vmem:[%s863_s3] sm:$0xff] %v462_v20  ;;  %v465_v57 = vmul.f32 1.050701, %v449_v55  ;;  %v457_v58 = vsel %vm361_vm5, %v734_v32, %v441_v51  ;;  %v439_v31 = vmul.f32 1.6732632, %v524_v25  ;;  %v529_v1 = vadd.f32 -1.0, %v630_v56  ;;  %v632_v2 = vpop.eup %631 }
 0x102   :  { %486 = vst [vmem:[%s863_s3 + $0x40] sm:$0xff] %v470_v54  ;;  %v473_v26 = vmul.f32 1.050701, %v457_v58  ;;  %v447_v3 = vsel %vm351_vm6, %v741_v44, %v431_v59  ;;  %v436_v32 = vmul.f32 1.6732632, %v521_v62  ;;  %v634_v4 = vpop.eup %633  ;;  %v519_v8 = vadd.f32 -1.0, %v632_v2 }
 0x103   :  { %481 = vst [vmem:[%s863_s3 + $0x18] sm:$0xff] %v465_v57  ;;  %v463_v5 = vmul.f32 1.050701, %v447_v3  ;;  %v455_v6 = vsel %vm359_vm7, %v744_v45, %v439_v31  ;;  %v444_v7 = vmul.f32 1.6732632, %v529_v1  ;;  %v636_v9 = vpop.eup %635  ;;  %v527_v44 = vadd.f32 -1.0, %v634_v4 }
 0x104   :  { %489 = vst [vmem:[%s863_s3 + $0x58] sm:$0xff] %v473_v26  ;;  %v471_v12 = vmul.f32 1.050701, %v455_v6  ;;  %v452_v13 = vsel %vm356_vm8, %v747_v46, %v436_v32  ;;  %v638_v14 = vpop.eup %637  ;;  %v434_v18 = vmul.f32 1.6732632, %v519_v8  ;;  %v522_v21 = vadd.f32 -1.0, %v636_v9 }
 0x105   :  { %479 = vst [vmem:[%s863_s3 + $0x8] sm:$0xff] %v463_v5  ;;  %v468_v15 = vmul.f32 1.050701, %v452_v13  ;;  %v460_v17 = vsel %vm364_vm9, %v750_v48, %v444_v7  ;;  %v442_v46 = vmul.f32 1.6732632, %v527_v44  ;;  %v530_v22 = vadd.f32 -1.0, %v638_v14  ;;  %v640_v23 = vpop.eup %639 }
 0x106   :  { %487 = vst [vmem:[%s863_s3 + $0x48] sm:$0xff] %v471_v12  ;;  %v476_v45 = vmul.f32 1.050701, %v460_v17  ;;  %v450_v24 = vsel %vm354_vm10, %v757_v60, %v434_v18  ;;  %v437_v48 = vmul.f32 1.6732632, %v522_v21  ;;  %v520_v29 = vadd.f32 -1.0, %v640_v23  ;;  %v642_v30 = vpop.eup %641 }
 0x107   :  { %484 = vst [vmem:[%s863_s3 + $0x30] sm:$0xff] %v468_v15  ;;  %v466_v16 = vmul.f32 1.050701, %v450_v24  ;;  %v458_v27 = vsel %vm362_vm11, %v760_v61, %v442_v46  ;;  %v445_v28 = vmul.f32 1.6732632, %v530_v22  ;;  %v528_v37 = vadd.f32 -1.0, %v642_v30 }
 0x108   :  { %492 = vst [vmem:[%s863_s3 + $0x70] sm:$0xff] %v476_v45  ;;  %v474_v33 = vmul.f32 1.050701, %v458_v27  ;;  %v453_v34 = vsel %vm357_vm12, %v763_v63, %v437_v48  ;;  %v435_v36 = vmul.f32 1.6732632, %v520_v29 }
 0x109   :  { %482 = vst [vmem:[%s863_s3 + $0x20] sm:$0xff] %v466_v16  ;;  %v469_v60 = vmul.f32 1.050701, %v453_v34  ;;  %v461_v35 = vsel %vm365_vm13, %v766_v0, %v445_v28  ;;  %v443_v38 = vmul.f32 1.6732632, %v528_v37 }
 0x10a   :  { %490 = vst [vmem:[%s863_s3 + $0x60] sm:$0xff] %v474_v33  ;;  %v477_v61 = vmul.f32 1.050701, %v461_v35  ;;  %v451_v63 = vsel %vm355_vm14, %v773_v10, %v435_v36 }
 0x10b   :  { %485 = vst [vmem:[%s863_s3 + $0x38] sm:$0xff] %v469_v60  ;;  %v467_v0 = vmul.f32 1.050701, %v451_v63  ;;  %v459_v39 = vsel %vm363_vm15, %v776_v11, %v443_v38 }
 0x10c   :  { %493 = vst [vmem:[%s863_s3 + $0x78] sm:$0xff] %v477_v61  ;;  %v475_v40 = vmul.f32 1.050701, %v459_v39 }
 0x10d   :  { %483 = vst [vmem:[%s863_s3 + $0x28] sm:$0xff] %v467_v0 }
 0x10e   :  { %491 = vst [vmem:[%s863_s3 + $0x68] sm:$0xff] %v475_v40 }

// kernel: mmd_net_d_forward.7
= control target key start
LH: loop header
LB: loop body
LE: loop exit
PB: predicated region body
PF: predicated region fallthrough
CT: control target
= control target key end

     0   :  { %v222_v27 = vlaneseq  ;;  %v382_v36 = vmov 0.0   ;;  %s464_s1 = inlined_call_operand.vmem [shape: bf16[128,128], index: 1, kind: input, shape index: {}]   ;;  %s465_s0 = inlined_call_operand.vmem [shape: bf16[32,128], index: 0, kind: input, shape index: {}]   ;;  %s466_s2 = inlined_call_operand.vmem [shape: f32[1,128], index: 2, kind: input, shape index: {}]   ;;  %s467_s3 = inlined_call_operand.vmem [shape: f32[1,128], index: 3, kind: input, shape index: {}]   ;;  %s468_s4 = inlined_call_operand.vmem [shape: f32[1,128], index: 4, kind: input, shape index: {}]   ;;  %s469_s5 = inlined_call_operand.vmem [shape: f32[32,128], index: 5, kind: output, shape index: {}]  }
   0x1   :  { %v356_v0 = vld [vmem:[%s464_s1 + $0x38] sm:$0xff]   ;;  %v357_v1 = vld [vmem:[%s464_s1 + $0x30] sm:$0xff]   ;;  %v358_v2 = vld [vmem:[%s464_s1 + $0x28] sm:$0xff]  }
   0x2   :  { %335 = vmatprep.subr.bf16.mxu0 %v356_v0  ;;  %v359_v3 = vld [vmem:[%s464_s1 + $0x20] sm:$0xff]   ;;  %v360_v5 = vld [vmem:[%s464_s1 + $0x18] sm:$0xff]   ;;  %v361_v6 = vld [vmem:[%s464_s1 + $0x10] sm:$0xff]   ;;  %v223_v28 = vand.u32 127, %v222_v27 }
   0x3   :  { %336 = vmatpush3.bf16.msra.mxu0 %v356_v0  ;;  %v364_v4 = vld [vmem:[%s465_s0] sm:$0xff]   ;;  %v362_v7 = vld [vmem:[%s464_s1 + $0x8] sm:$0xff]  }
   0x4   :  { %337 = vmatprep.subr.bf16.mxu0 %v357_v1  ;;  %351 = vmatprep.mubr.bf16.mxu0 %v364_v4  ;;  %v363_v8 = vld [vmem:[%s464_s1] sm:$0xff]   ;;  %v365_v9 = vld [vmem:[%s465_s0 + $0x8] sm:$0xff]   ;;  %vm224_vm0 = vcmp.lt.s32.totalorder %v223_v28, 16 }
   0x5   :  { %v317_v10 = vld [vmem:[%s466_s2] ss:$0 sm:$0xff]  ;;  %v322_v37 = vsel %vm224_vm0, 1.0, %v382_v36 }
   0x7   :  { %338 = vmatpush3.bf16.msra.mxu0 %v357_v1 }
   0x8   :  { %339 = vmatprep.subr.bf16.mxu0 %v358_v2 }
   0xb   :  { %340 = vmatpush3.bf16.msra.mxu0 %v358_v2 }
   0xc   :  { %341 = vmatprep.subr.bf16.mxu0 %v359_v3 }
   0xf   :  { %342 = vmatpush3.bf16.msra.mxu0 %v359_v3 }
  0x10   :  { %343 = vmatprep.subr.bf16.mxu0 %v360_v5 }
  0x13   :  { %344 = vmatpush3.bf16.msra.mxu0 %v360_v5 }
  0x14   :  { %345 = vmatprep.subr.bf16.mxu0 %v361_v6 }
  0x17   :  { %346 = vmatpush3.bf16.msra.mxu0 %v361_v6 }
  0x18   :  { %347 = vmatprep.subr.bf16.mxu0 %v362_v7 }
  0x1b   :  { %348 = vmatpush3.bf16.msra.mxu0 %v362_v7 }
  0x1c   :  { %349 = vmatprep.subr.bf16.mxu0 %v363_v8 }
  0x1f   :  { %350 = vmatpush3.bf16.msra.mxu0 %v363_v8 }
  0x22   :  { %352 = vmatmul.mubr.bf16.vlgmr.msra.gmra.mxu0 %v365_v9 }
  0xe2   :  { %v353_v11 = vpop.f32.mrf.mxu0 }
  0xe3   :  { %v186_v12 = vadd.f32 %v353_v11, %v317_v10 }
  0xe4   :  { %v147_v13 = vpop.f32.mrf.mxu0 }
  0xe5   :  { %v196_v14 = vmin.f32 %v186_v12, 0.0  ;;  %v184_v15 = vadd.f32 %v317_v10, %v147_v13  ;;  %vm192_vm1 = vcmp.gt.f32.partialorder %v186_v12, 0.0 }
  0xe6   :  { %v354_v16 = vpop.f32.mrf.mxu0 }
  0xe7   :  { %v202_v17 = vmul.f32 1.442695, %v196_v14  ;;  %v194_v18 = vmin.f32 %v184_v15, 0.0  ;;  %v187_v19 = vadd.f32 %v354_v16, %v317_v10  ;;  %vm190_vm2 = vcmp.gt.f32.partialorder %v184_v15, 0.0 }
  0xe8   :  { %v150_v20 = vpop.f32.mrf.mxu0 }
  0xe9   :  { %366 = vpow2.f32 %v202_v17  ;;  %v198_v21 = vmul.f32 1.442695, %v194_v18  ;;  %v197_v22 = vmin.f32 %v187_v19, 0.0  ;;  %v185_v23 = vadd.f32 %v317_v10, %v150_v20 }
  0xea   :  { %vm193_vm3 = vcmp.gt.f32.partialorder %v187_v19, 0.0 }
  0xeb   :  { %368 = vpow2.f32 %v198_v21  ;;  %v204_v24 = vmul.f32 1.442695, %v197_v22  ;;  %v195_v25 = vmin.f32 %v185_v23, 0.0  ;;  %vm191_vm4 = vcmp.gt.f32.partialorder %v185_v23, 0.0 }
  0xed   :  { %370 = vpow2.f32 %v204_v24  ;;  %v200_v26 = vmul.f32 1.442695, %v195_v25 }
  0xef   :  { %372 = vpow2.f32 %v200_v26  ;;  %v324_v26 = vld [vmem:[%s468_s4] ss:$0 sm:$0xff] }
  0xf6   :  { %v367_v29 = vpop.eup %366 }
  0xf7   :  { %v320_v30 = vadd.f32 -1.0, %v367_v29 }
  0xf8   :  { %v369_v31 = vpop.eup %368 }
  0xf9   :  { %v212_v32 = vmul.f32 1.6732632, %v320_v30  ;;  %v318_v33 = vadd.f32 -1.0, %v369_v31 }
  0xfa   :  { %v371_v34 = vpop.eup %370 }
  0xfb   :  { %v216_v35 = vsel %vm192_vm1, %v186_v12, %v212_v32  ;;  %v210_v38 = vmul.f32 1.6732632, %v318_v33  ;;  %v321_v39 = vadd.f32 -1.0, %v371_v34 }
  0xfc   :  { %v220_v40 = vmul.f32 1.050701, %v216_v35  ;;  %v373_v41 = vpop.eup %372 }
  0xfd   :  { %v214_v42 = vsel %vm190_vm2, %v184_v15, %v210_v38  ;;  %v213_v43 = vmul.f32 1.6732632, %v321_v39  ;;  %v319_v46 = vadd.f32 -1.0, %v373_v41 }
  0xfe   :  { %v229_v44 = vmul.f32 %v322_v37, %v220_v40  ;;  %v218_v45 = vmul.f32 1.050701, %v214_v42 }
  0xff   :  { %v217_v47 = vsel %vm193_vm3, %v187_v19, %v213_v43  ;;  %v211_v50 = vmul.f32 1.6732632, %v319_v46 }
 0x100   :  { %235 = vadd.xlane.f32.xlu1 %v229_v44  ;;  %v227_v48 = vmul.f32 %v322_v37, %v218_v45  ;;  %v221_v49 = vmul.f32 1.050701, %v217_v47 }
 0x101   :  { %v215_v52 = vsel %vm191_vm4, %v185_v23, %v211_v50  ;;  %v323_v23 = vld [vmem:[%s467_s3] ss:$0 sm:$0xff] }
 0x102   :  { %231 = vadd.xlane.f32.xlu0 %v227_v48  ;;  %v230_v51 = vmul.f32 %v322_v37, %v221_v49  ;;  %v219_v53 = vmul.f32 1.050701, %v215_v52 }
 0x104   :  { %237 = vadd.xlane.f32.xlu1 %v230_v51  ;;  %v228_v54 = vmul.f32 %v322_v37, %v219_v53 }
 0x106   :  { %233 = vadd.xlane.f32.xlu0 %v228_v54 }
 0x189   :  { %v236_v55 = vpop.xlane.xlu1 %235 }
 0x18a   :  { %v241_v56 = vmul.f32 0.0625, %v236_v55 }
 0x18b   :  { %v232_v57 = vpop.xlane.xlu0 %231 }
 0x18c   :  { %v239_v58 = vmul.f32 0.0625, %v232_v57  ;;  %v245_v60 = vsub.f32 %v220_v40, %v241_v56 }
 0x18d   :  { %v238_v59 = vpop.xlane.xlu1 %237 }
 0x18e   :  { %v243_v61 = vsub.f32 %v218_v45, %v239_v58  ;;  %v242_v62 = vmul.f32 0.0625, %v238_v59  ;;  %v249_v3 = vmul.f32 %v322_v37, %v245_v60 }
 0x18f   :  { %v234_v63 = vpop.xlane.xlu0 %233 }
 0x190   :  { %v247_v0 = vmul.f32 %v322_v37, %v243_v61  ;;  %v240_v1 = vmul.f32 0.0625, %v234_v63  ;;  %v246_v4 = vsub.f32 %v221_v49, %v242_v62  ;;  %v253_v7 = vmul.f32 %v249_v3, %v249_v3 }
 0x192   :  { %v251_v2 = vmul.f32 %v247_v0, %v247_v0  ;;  %v244_v5 = vsub.f32 %v219_v53, %v240_v1  ;;  %v250_v9 = vmul.f32 %v322_v37, %v246_v4 }
 0x194   :  { %255 = vadd.xlane.f32.xlu0 %v251_v2  ;;  %v248_v6 = vmul.f32 %v322_v37, %v244_v5  ;;  %v254_v10 = vmul.f32 %v250_v9, %v250_v9 }
 0x196   :  { %v252_v8 = vmul.f32 %v248_v6, %v248_v6 }
 0x198   :  { %259 = vadd.xlane.f32.xlu0 %v253_v7  ;;  %257 = vadd.xlane.f32.xlu1 %v252_v8 }
 0x19c   :  { %261 = vadd.xlane.f32.xlu1 %v254_v10 }
 0x21d   :  { %v256_v11 = vpop.xlane.xlu0 %255 }
 0x21e   :  { %v263_v12 = vmul.f32 0.06666667, %v256_v11 }
 0x220   :  { %v267_v13 = vadd.f32 1e-09, %v263_v12 }
 0x221   :  { %v260_v14 = vpop.xlane.xlu0 %259  ;;  %v258_v15 = vpop.xlane.xlu1 %257 }
 0x222   :  { %374 = vrsqrt.f32 %v267_v13  ;;  %v265_v16 = vmul.f32 0.06666667, %v260_v14  ;;  %v264_v17 = vmul.f32 0.06666667, %v258_v15 }
 0x224   :  { %v269_v18 = vadd.f32 1e-09, %v265_v16  ;;  %v268_v19 = vadd.f32 1e-09, %v264_v17 }
 0x225   :  { %v262_v20 = vpop.xlane.xlu1 %261 }
 0x226   :  { %376 = vrsqrt.f32 %v269_v18  ;;  %v266_v21 = vmul.f32 0.06666667, %v262_v20 }
 0x227   :  { %378 = vrsqrt.f32 %v268_v19 }
 0x228   :  { %v270_v22 = vadd.f32 1e-09, %v266_v21 }
 0x22a   :  { %380 = vrsqrt.f32 %v270_v22 }
 0x22f   :  { %v375_v24 = vpop.eup %374 }
 0x230   :  { %v281_v25 = vmul.f32 %v375_v24, %v323_v23 }
 0x232   :  { %v285_v27 = vmul.f32 %v281_v25, %v243_v61 }
 0x233   :  { %v377_v28 = vpop.eup %376 }
 0x234   :  { %v379_v29 = vpop.eup %378  ;;  %v295_v30 = vadd.f32 %v324_v26, %v285_v27  ;;  %v283_v31 = vmul.f32 %v377_v28, %v323_v23 }
 0x235   :  { %v282_v32 = vmul.f32 %v379_v29, %v323_v23 }
 0x236   :  { %299 = vst [vmem:[%s469_s5] sm:$0xff] %v295_v30  ;;  %v287_v33 = vmul.f32 %v283_v31, %v245_v60 }
 0x237   :  { %v286_v34 = vmul.f32 %v282_v32, %v244_v5  ;;  %v381_v35 = vpop.eup %380 }
 0x238   :  { %v297_v36 = vadd.f32 %v324_v26, %v287_v33  ;;  %v284_v38 = vmul.f32 %v381_v35, %v323_v23 }
 0x239   :  { %v296_v37 = vadd.f32 %v324_v26, %v286_v34 }
 0x23a   :  { %301 = vst [vmem:[%s469_s5 + $0x10] sm:$0xff] %v297_v36  ;;  %v288_v39 = vmul.f32 %v284_v38, %v246_v4 }
 0x23b   :  { %300 = vst [vmem:[%s469_s5 + $0x8] sm:$0xff] %v296_v37 }
 0x23c   :  { %v298_v40 = vadd.f32 %v324_v26, %v288_v39 }
 0x23e   :  { %302 = vst [vmem:[%s469_s5 + $0x18] sm:$0xff] %v298_v40 }

// kernel: mmd_net_d_forward.8
= control target key start
LH: loop header
LB: loop body
LE: loop exit
PB: predicated region body
PF: predicated region fallthrough
CT: control target
= control target key end

     0   :  { %s352_s1 = inlined_call_operand.vmem [shape: bf16[256,128], index: 1, kind: input, shape index: {}]   ;;  %s353_s0 = inlined_call_operand.vmem [shape: bf16[8,256], index: 0, kind: input, shape index: {}]   ;;  %s354_s2 = inlined_call_operand.vmem [shape: f32[1,128], index: 2, kind: input, shape index: {}]   ;;  %s355_s3 = inlined_call_operand.vmem [shape: f32[8,128], index: 3, kind: output, shape index: {}]  }
   0x1   :  { %v257_v0 = vld [vmem:[%s352_s1 + $0x78] sm:$0xff]   ;;  %v259_v2 = vld [vmem:[%s352_s1 + $0x70] sm:$0xff]   ;;  %v261_v4 = vld [vmem:[%s352_s1 + $0x68] sm:$0xff]  }
   0x2   :  { %v258_v1 = vld [vmem:[%s352_s1 + $0x38] sm:$0xff]   ;;  %235 = vmatprep.subr.bf16.mxu0 %v257_v0  ;;  %v260_v3 = vld [vmem:[%s352_s1 + $0x30] sm:$0xff]   ;;  %v262_v5 = vld [vmem:[%s352_s1 + $0x28] sm:$0xff]  }
   0x3   :  { %236 = vmatpush3.bf16.msra.mxu0 %v258_v1  ;;  %v263_v6 = vld [vmem:[%s352_s1 + $0x60] sm:$0xff]   ;;  %v265_v8 = vld [vmem:[%s352_s1 + $0x58] sm:$0xff]   ;;  %v267_v10 = vld [vmem:[%s352_s1 + $0x50] sm:$0xff]  }
   0x4   :  { %237 = vmatprep.subr.bf16.mxu0 %v259_v2  ;;  %v264_v7 = vld [vmem:[%s352_s1 + $0x20] sm:$0xff]   ;;  %v266_v9 = vld [vmem:[%s352_s1 + $0x18] sm:$0xff]   ;;  %v268_v13 = vld [vmem:[%s352_s1 + $0x10] sm:$0xff]  }
   0x5   :  { %v21_v11 = vld [vmem:[%s353_s0] sm:$0xff]  ;;  %v269_v14 = vld [vmem:[%s352_s1 + $0x48] sm:$0xff]  }
   0x6   :  { %v217_v12 = vcombine.high %v21_v11, %v21_v11  ;;  %v270_v15 = vld [vmem:[%s352_s1 + $0x8] sm:$0xff]   ;;  %v271_v16 = vld [vmem:[%s352_s1 + $0x40] sm:$0xff]   ;;  %v216_v18 = vcombine.low %v21_v11, %v21_v11 }
   0x7   :  { %238 = vmatpush3.bf16.msra.mxu0 %v260_v3  ;;  %v272_v17 = vld [vmem:[%s352_s1] sm:$0xff]  }
   0x8   :  { %239 = vmatprep.subr.bf16.mxu0 %v261_v4  ;;  %189 = vmatprep.mubr.bf16.mxu0 %v217_v12  ;;  %v234_v21 = vld [vmem:[%s354_s2] ss:$0 sm:$0xff] }
   0xb   :  { %240 = vmatpush3.bf16.msra.mxu0 %v262_v5 }
   0xc   :  { %241 = vmatprep.subr.bf16.mxu0 %v263_v6 }
   0xf   :  { %242 = vmatpush3.bf16.msra.mxu0 %v264_v7 }
  0x10   :  { %243 = vmatprep.subr.bf16.mxu0 %v265_v8 }
  0x13   :  { %244 = vmatpush3.bf16.msra.mxu0 %v266_v9 }
  0x14   :  { %245 = vmatprep.subr.bf16.mxu0 %v267_v10 }
  0x17   :  { %246 = vmatpush3.bf16.msra.mxu0 %v268_v13 }
  0x18   :  { %247 = vmatprep.subr.bf16.mxu0 %v269_v14 }
  0x1b   :  { %248 = vmatpush3.bf16.msra.mxu0 %v270_v15 }
  0x1c   :  { %249 = vmatprep.subr.bf16.mxu0 %v271_v16 }
  0x1f   :  { %250 = vmatpush3.bf16.msra.mxu0 %v272_v17 }
  0x22   :  { %190 = vmatmul.mubr.bf16.vlgmr.msra.gmra.mxu0 %v216_v18 }
  0xe2   :  { %v251_v19 = vpop.f32.mrf.mxu0 }
  0xe4   :  { %v252_v20 = vpop.f32.mrf.mxu0 }
  0xe5   :  { %v253_v22 = vadd.f32 %v252_v20, %v251_v19 }
  0xe6   :  { %v254_v23 = vpop.f32.mrf.mxu0 }
  0xe7   :  { %v210_v24 = vadd.f32 %v253_v22, %v234_v21 }
  0xe8   :  { %v255_v25 = vpop.f32.mrf.mxu0 }
  0xe9   :  { %211 = vst [vmem:[%s355_s3] sm:$0xff] %v210_v24 }

// kernel: mmd_net_d_forward.9
= control target key start
LH: loop header
LB: loop body
LE: loop exit
PB: predicated region body
PF: predicated region fallthrough
CT: control target
= control target key end

     0   :  { %s350_s1 = inlined_call_operand.vmem [shape: bf16[128,128], index: 1, kind: input, shape index: {}]   ;;  %s351_s0 = inlined_call_operand.vmem [shape: bf16[32,128], index: 0, kind: input, shape index: {}]   ;;  %s352_s2 = inlined_call_operand.vmem [shape: f32[1,128], index: 2, kind: input, shape index: {}]   ;;  %s353_s3 = inlined_call_operand.vmem [shape: f32[32,128], index: 3, kind: output, shape index: {}]  }
   0x1   :  { %v267_v0 = vld [vmem:[%s350_s1 + $0x38] sm:$0xff]   ;;  %v268_v1 = vld [vmem:[%s350_s1 + $0x30] sm:$0xff]   ;;  %v269_v2 = vld [vmem:[%s350_s1 + $0x28] sm:$0xff]  }
   0x2   :  { %247 = vmatprep.subr.bf16.mxu0 %v267_v0  ;;  %v270_v3 = vld [vmem:[%s350_s1 + $0x20] sm:$0xff]   ;;  %v271_v5 = vld [vmem:[%s350_s1 + $0x18] sm:$0xff]   ;;  %v272_v6 = vld [vmem:[%s350_s1 + $0x10] sm:$0xff]  }
   0x3   :  { %248 = vmatpush3.bf16.msra.mxu0 %v267_v0  ;;  %v275_v4 = vld [vmem:[%s351_s0] sm:$0xff]   ;;  %v273_v7 = vld [vmem:[%s350_s1 + $0x8] sm:$0xff]  }
   0x4   :  { %249 = vmatprep.subr.bf16.mxu0 %v268_v1  ;;  %263 = vmatprep.mubr.bf16.mxu0 %v275_v4  ;;  %v274_v8 = vld [vmem:[%s350_s1] sm:$0xff]   ;;  %v276_v9 = vld [vmem:[%s351_s0 + $0x8] sm:$0xff]  }
   0x5   :  { %v232_v10 = vld [vmem:[%s352_s2] ss:$0 sm:$0xff] }
   0x7   :  { %250 = vmatpush3.bf16.msra.mxu0 %v268_v1 }
   0x8   :  { %251 = vmatprep.subr.bf16.mxu0 %v269_v2 }
   0xb   :  { %252 = vmatpush3.bf16.msra.mxu0 %v269_v2 }
   0xc   :  { %253 = vmatprep.subr.bf16.mxu0 %v270_v3 }
   0xf   :  { %254 = vmatpush3.bf16.msra.mxu0 %v270_v3 }
  0x10   :  { %255 = vmatprep.subr.bf16.mxu0 %v271_v5 }
  0x13   :  { %256 = vmatpush3.bf16.msra.mxu0 %v271_v5 }
  0x14   :  { %257 = vmatprep.subr.bf16.mxu0 %v272_v6 }
  0x17   :  { %258 = vmatpush3.bf16.msra.mxu0 %v272_v6 }
  0x18   :  { %259 = vmatprep.subr.bf16.mxu0 %v273_v7 }
  0x1b   :  { %260 = vmatpush3.bf16.msra.mxu0 %v273_v7 }
  0x1c   :  { %261 = vmatprep.subr.bf16.mxu0 %v274_v8 }
  0x1f   :  { %262 = vmatpush3.bf16.msra.mxu0 %v274_v8 }
  0x22   :  { %264 = vmatmul.mubr.bf16.vlgmr.msra.gmra.mxu0 %v276_v9 }
  0xe2   :  { %v265_v11 = vpop.f32.mrf.mxu0 }
  0xe3   :  { %v180_v12 = vadd.f32 %v265_v11, %v232_v10 }
  0xe4   :  { %v141_v13 = vpop.f32.mrf.mxu0 }
  0xe5   :  { %v188_v14 = vmin.f32 %v180_v12, 0.0  ;;  %v178_v15 = vadd.f32 %v232_v10, %v141_v13  ;;  %vm184_vm0 = vcmp.gt.f32.partialorder %v180_v12, 0.0 }
  0xe6   :  { %v266_v16 = vpop.f32.mrf.mxu0 }
  0xe7   :  { %v194_v17 = vmul.f32 1.442695, %v188_v14  ;;  %v186_v18 = vmin.f32 %v178_v15, 0.0  ;;  %v181_v19 = vadd.f32 %v266_v16, %v232_v10  ;;  %vm182_vm1 = vcmp.gt.f32.partialorder %v178_v15, 0.0 }
  0xe8   :  { %v144_v20 = vpop.f32.mrf.mxu0 }
  0xe9   :  { %277 = vpow2.f32 %v194_v17  ;;  %v190_v21 = vmul.f32 1.442695, %v186_v18  ;;  %v189_v22 = vmin.f32 %v181_v19, 0.0  ;;  %v179_v23 = vadd.f32 %v232_v10, %v144_v20 }
  0xea   :  { %vm185_vm2 = vcmp.gt.f32.partialorder %v181_v19, 0.0 }
  0xeb   :  { %279 = vpow2.f32 %v190_v21  ;;  %v196_v24 = vmul.f32 1.442695, %v189_v22  ;;  %v187_v25 = vmin.f32 %v179_v23, 0.0  ;;  %vm183_vm3 = vcmp.gt.f32.partialorder %v179_v23, 0.0 }
  0xed   :  { %281 = vpow2.f32 %v196_v24  ;;  %v192_v26 = vmul.f32 1.442695, %v187_v25 }
  0xef   :  { %283 = vpow2.f32 %v192_v26 }
  0xf6   :  { %v278_v27 = vpop.eup %277 }
  0xf7   :  { %v235_v28 = vadd.f32 -1.0, %v278_v27 }
  0xf8   :  { %v280_v29 = vpop.eup %279 }
  0xf9   :  { %v204_v30 = vmul.f32 1.6732632, %v235_v28  ;;  %v233_v31 = vadd.f32 -1.0, %v280_v29 }
  0xfa   :  { %v282_v32 = vpop.eup %281 }
  0xfb   :  { %v208_v33 = vsel %vm184_vm0, %v180_v12, %v204_v30  ;;  %v202_v34 = vmul.f32 1.6732632, %v233_v31  ;;  %v236_v35 = vadd.f32 -1.0, %v282_v32 }
  0xfc   :  { %v212_v36 = vmul.f32 1.050701, %v208_v33  ;;  %v284_v37 = vpop.eup %283 }
  0xfd   :  { %v206_v38 = vsel %vm182_vm1, %v178_v15, %v202_v34  ;;  %v205_v39 = vmul.f32 1.6732632, %v236_v35  ;;  %v234_v41 = vadd.f32 -1.0, %v284_v37 }
  0xfe   :  { %216 = vst [vmem:[%s353_s3 + $0x10] sm:$0xff] %v212_v36  ;;  %v210_v40 = vmul.f32 1.050701, %v206_v38 }
  0xff   :  { %v209_v42 = vsel %vm185_vm2, %v181_v19, %v205_v39  ;;  %v203_v44 = vmul.f32 1.6732632, %v234_v41 }
 0x100   :  { %214 = vst [vmem:[%s353_s3] sm:$0xff] %v210_v40  ;;  %v213_v43 = vmul.f32 1.050701, %v209_v42 }
 0x101   :  { %v207_v45 = vsel %vm183_vm3, %v179_v23, %v203_v44 }
 0x102   :  { %217 = vst [vmem:[%s353_s3 + $0x18] sm:$0xff] %v213_v43  ;;  %v211_v46 = vmul.f32 1.050701, %v207_v45 }
 0x104   :  { %215 = vst [vmem:[%s353_s3 + $0x8] sm:$0xff] %v211_v46 }

// kernel: mmd_net_d_forward.10
= control target key start
LH: loop header
LB: loop body
LE: loop exit
PB: predicated region body
PF: predicated region fallthrough
CT: control target
= control target key end

     0   :  { %s1068_s1 = inlined_call_operand.vmem [shape: bf16[256,128], index: 1, kind: input, shape index: {}]   ;;  %s1069_s0 = inlined_call_operand.vmem [shape: bf16[128,256], index: 0, kind: input, shape index: {}]   ;;  %s1070_s2 = inlined_call_operand.vmem [shape: f32[1,128], index: 2, kind: input, shape index: {}]   ;;  %s1071_s3 = inlined_call_operand.vmem [shape: f32[128,128], index: 3, kind: output, shape index: {}]  }
   0x1   :  { %v723_v0 = vld [vmem:[%s1068_s1 + $0x78] sm:$0xff]   ;;  %v725_v2 = vld [vmem:[%s1068_s1 + $0x70] sm:$0xff]   ;;  %v727_v4 = vld [vmem:[%s1068_s1 + $0x68] sm:$0xff]  }
   0x2   :  { %v724_v1 = vld [vmem:[%s1068_s1 + $0x38] sm:$0xff]   ;;  %643 = vmatprep.subr.bf16.mxu0 %v723_v0  ;;  %707 = vmatprep.subr.bf16.mxu1 %v723_v0  ;;  %v726_v3 = vld [vmem:[%s1068_s1 + $0x30] sm:$0xff]   ;;  %v728_v5 = vld [vmem:[%s1068_s1 + $0x28] sm:$0xff]  }
   0x3   :  { %644 = vmatpush3.bf16.msra.mxu0 %v724_v1  ;;  %715 = vmatpush3.bf16.msra.mxu1 %v724_v1  ;;  %v729_v6 = vld [vmem:[%s1068_s1 + $0x60] sm:$0xff]   ;;  %v731_v8 = vld [vmem:[%s1068_s1 + $0x58] sm:$0xff]   ;;  %v733_v10 = vld [vmem:[%s1068_s1 + $0x50] sm:$0xff]  }
   0x4   :  { %645 = vmatprep.subr.bf16.mxu0 %v725_v2  ;;  %708 = vmatprep.subr.bf16.mxu1 %v725_v2  ;;  %v730_v7 = vld [vmem:[%s1068_s1 + $0x20] sm:$0xff]   ;;  %v732_v9 = vld [vmem:[%s1068_s1 + $0x18] sm:$0xff]   ;;  %v734_v13 = vld [vmem:[%s1068_s1 + $0x10] sm:$0xff]  }
   0x5   :  { %v741_v11 = vld [vmem:[%s1069_s0 + $0x4] ss:$8 sps:$4 sm:$0xff]   ;;  %v739_v18 = vld [vmem:[%s1069_s0] ss:$8 sps:$4 sm:$0xff]   ;;  %v745_v20 = vld [vmem:[%s1069_s0 + $0x14] ss:$8 sps:$4 sm:$0xff]  }
   0x6   :  { %v744_v12 = vld [vmem:[%s1069_s0 + $0x44] ss:$8 sps:$4 sm:$0xff]   ;;  %307 = vmatprep.mubr.bf16.mxu0 %v741_v11  ;;  %v742_v19 = vld [vmem:[%s1069_s0 + $0x40] ss:$8 sps:$4 sm:$0xff]   ;;  %v747_v21 = vld [vmem:[%s1069_s0 + $0x54] ss:$8 sps:$4 sm:$0xff]  }
   0x7   :  { %646 = vmatpush3.bf16.msra.mxu0 %v726_v3  ;;  %716 = vmatpush3.bf16.msra.mxu1 %v726_v3  ;;  %v735_v14 = vld [vmem:[%s1068_s1 + $0x48] sm:$0xff]   ;;  %v737_v16 = vld [vmem:[%s1068_s1 + $0x40] sm:$0xff]   ;;  %v749_v22 = vld [vmem:[%s1069_s0 + $0x10] ss:$8 sps:$4 sm:$0xff]  }
   0x8   :  { %647 = vmatprep.subr.bf16.mxu0 %v727_v4  ;;  %709 = vmatprep.subr.bf16.mxu1 %v727_v4  ;;  %v736_v15 = vld [vmem:[%s1068_s1 + $0x8] sm:$0xff]   ;;  %v738_v17 = vld [vmem:[%s1068_s1] sm:$0xff]   ;;  %v750_v23 = vld [vmem:[%s1069_s0 + $0x50] ss:$8 sps:$4 sm:$0xff]  }
   0x9   :  { %339 = vmatprep.mubr.bf16.mxu1 %v744_v12  ;;  %v751_v24 = vld [vmem:[%s1069_s0 + $0x24] ss:$8 sps:$4 sm:$0xff]   ;;  %v755_v26 = vld [vmem:[%s1069_s0 + $0x20] ss:$8 sps:$4 sm:$0xff]   ;;  %v757_v28 = vld [vmem:[%s1069_s0 + $0x34] ss:$8 sps:$4 sm:$0xff]  }
   0xa   :  { %v753_v25 = vld [vmem:[%s1069_s0 + $0x64] ss:$8 sps:$4 sm:$0xff]   ;;  %v756_v27 = vld [vmem:[%s1069_s0 + $0x60] ss:$8 sps:$4 sm:$0xff]   ;;  %v759_v29 = vld [vmem:[%s1069_s0 + $0x74] ss:$8 sps:$4 sm:$0xff]  }
   0xb   :  { %648 = vmatpush3.bf16.msra.mxu0 %v728_v5  ;;  %717 = vmatpush3.bf16.msra.mxu1 %v728_v5  ;;  %v761_v30 = vld [vmem:[%s1069_s0 + $0x30] ss:$8 sps:$4 sm:$0xff]   ;;  %v914_v35 = vld [vmem:[%s1070_s2] ss:$0 sm:$0xff] }
   0xc   :  { %649 = vmatprep.subr.bf16.mxu0 %v729_v6  ;;  %710 = vmatprep.subr.bf16.mxu1 %v729_v6  ;;  %v762_v31 = vld [vmem:[%s1069_s0 + $0x70] ss:$8 sps:$4 sm:$0xff]  }
   0xf   :  { %650 = vmatpush3.bf16.msra.mxu0 %v730_v7  ;;  %718 = vmatpush3.bf16.msra.mxu1 %v730_v7 }
  0x10   :  { %651 = vmatprep.subr.bf16.mxu0 %v731_v8  ;;  %711 = vmatprep.subr.bf16.mxu1 %v731_v8 }
  0x13   :  { %652 = vmatpush3.bf16.msra.mxu0 %v732_v9  ;;  %719 = vmatpush3.bf16.msra.mxu1 %v732_v9 }
  0x14   :  { %653 = vmatprep.subr.bf16.mxu0 %v733_v10  ;;  %712 = vmatprep.subr.bf16.mxu1 %v733_v10 }
  0x17   :  { %654 = vmatpush3.bf16.msra.mxu0 %v734_v13  ;;  %720 = vmatpush3.bf16.msra.mxu1 %v734_v13 }
  0x18   :  { %655 = vmatprep.subr.bf16.mxu0 %v735_v14  ;;  %713 = vmatprep.subr.bf16.mxu1 %v735_v14 }
  0x1b   :  { %656 = vmatpush3.bf16.msra.mxu0 %v736_v15  ;;  %721 = vmatpush3.bf16.msra.mxu1 %v736_v15 }
  0x1c   :  { %657 = vmatprep.subr.bf16.mxu0 %v737_v16  ;;  %714 = vmatprep.subr.bf16.mxu1 %v737_v16 }
  0x1f   :  { %658 = vmatpush3.bf16.msra.mxu0 %v738_v17  ;;  %722 = vmatpush3.bf16.msra.mxu1 %v738_v17 }
  0x22   :  { %308 = vmatmul.mubr.bf16.vlgmr.msra.gmra.mxu0 %v739_v18  ;;  %340 = vmatmul.mubr.bf16.vlgmr.msra.gmra.mxu1 %v742_v19 }
  0x23   :  { %315 = vmatprep.mubr.bf16.mxu0 %v745_v20  ;;  %347 = vmatprep.mubr.bf16.mxu1 %v747_v21 }
  0x2a   :  { %316 = vmatmul.mubr.bf16.gmra.mxu0 %v749_v22  ;;  %348 = vmatmul.mubr.bf16.gmra.mxu1 %v750_v23 }
  0x2b   :  { %323 = vmatprep.mubr.bf16.mxu0 %v751_v24  ;;  %355 = vmatprep.mubr.bf16.mxu1 %v753_v25 }
  0x32   :  { %324 = vmatmul.mubr.bf16.gmra.mxu0 %v755_v26  ;;  %356 = vmatmul.mubr.bf16.gmra.mxu1 %v756_v27 }
  0x33   :  { %331 = vmatprep.mubr.bf16.mxu0 %v757_v28  ;;  %363 = vmatprep.mubr.bf16.mxu1 %v759_v29 }
  0x3a   :  { %332 = vmatmul.mubr.bf16.gmra.mxu0 %v761_v30  ;;  %364 = vmatmul.mubr.bf16.gmra.mxu1 %v762_v31 }
  0xe2   :  { %v659_v32 = vpop.f32.mrf.mxu0  ;;  %v683_v33 = vpop.f32.mrf.mxu1 }
  0xe4   :  { %v660_v34 = vpop.f32.mrf.mxu0  ;;  %v684_v36 = vpop.f32.mrf.mxu1 }
  0xe5   :  { %v661_v37 = vadd.f32 %v660_v34, %v659_v32  ;;  %v685_v38 = vadd.f32 %v684_v36, %v683_v33 }
  0xe6   :  { %v662_v39 = vpop.f32.mrf.mxu0  ;;  %v686_v40 = vpop.f32.mrf.mxu1 }
  0xe7   :  { %v917_v41 = vadd.f32 %v661_v37, %v914_v35  ;;  %v920_v42 = vadd.f32 %v685_v38, %v914_v35 }
  0xe8   :  { %v663_v43 = vpop.f32.mrf.mxu0  ;;  %v687_v44 = vpop.f32.mrf.mxu1 }
  0xe9   :  { %v462_v45 = vmin.f32 %v917_v41, 0.0  ;;  %v470_v46 = vmin.f32 %v920_v42, 0.0  ;;  %v664_v47 = vadd.f32 %v663_v43, %v662_v39  ;;  %v688_v48 = vadd.f32 %v687_v44, %v686_v40 }
  0xea   :  { %v665_v49 = vpop.f32.mrf.mxu0  ;;  %v689_v50 = vpop.f32.mrf.mxu1  ;;  %vm446_vm0 = vcmp.gt.f32.partialorder %v917_v41, 0.0  ;;  %vm454_vm1 = vcmp.gt.f32.partialorder %v920_v42, 0.0 }
  0xeb   :  { %v478_v51 = vmul.f32 1.442695, %v462_v45  ;;  %v494_v52 = vmul.f32 1.442695, %v470_v46  ;;  %v925_v53 = vadd.f32 %v664_v47, %v914_v35  ;;  %v928_v54 = vadd.f32 %v688_v48, %v914_v35 }
  0xec   :  { %v666_v55 = vpop.f32.mrf.mxu0  ;;  %v690_v56 = vpop.f32.mrf.mxu1 }
  0xed   :  { %763 = vpow2.f32 %v478_v51  ;;  %v667_v57 = vadd.f32 %v666_v55, %v665_v49  ;;  %v691_v58 = vadd.f32 %v690_v56, %v689_v50  ;;  %v463_v59 = vmin.f32 %v925_v53, 0.0 }
  0xee   :  { %765 = vpow2.f32 %v494_v52  ;;  %v668_v60 = vpop.f32.mrf.mxu0  ;;  %v692_v61 = vpop.f32.mrf.mxu1  ;;  %v471_v62 = vmin.f32 %v928_v54, 0.0  ;;  %vm447_vm2 = vcmp.gt.f32.partialorder %v925_v53, 0.0  ;;  %vm455_vm3 = vcmp.gt.f32.partialorder %v928_v54, 0.0 }
  0xef   :  { %v933_v63 = vadd.f32 %v667_v57, %v914_v35  ;;  %v936_v0 = vadd.f32 %v691_v58, %v914_v35  ;;  %v480_v1 = vmul.f32 1.442695, %v463_v59 }
  0xf0   :  { %v669_v2 = vpop.f32.mrf.mxu0  ;;  %v693_v3 = vpop.f32.mrf.mxu1  ;;  %v496_v4 = vmul.f32 1.442695, %v471_v62 }
  0xf1   :  { %v464_v5 = vmin.f32 %v933_v63, 0.0  ;;  %767 = vpow2.f32 %v480_v1  ;;  %v472_v6 = vmin.f32 %v936_v0, 0.0  ;;  %v670_v7 = vadd.f32 %v669_v2, %v668_v60 }
  0xf2   :  { %v694_v8 = vadd.f32 %v693_v3, %v692_v61  ;;  %v671_v9 = vpop.f32.mrf.mxu0  ;;  %v695_v10 = vpop.f32.mrf.mxu1  ;;  %769 = vpow2.f32 %v496_v4  ;;  %vm448_vm4 = vcmp.gt.f32.partialorder %v933_v63, 0.0  ;;  %vm456_vm5 = vcmp.gt.f32.partialorder %v936_v0, 0.0 }
  0xf3   :  { %v482_v11 = vmul.f32 1.442695, %v464_v5  ;;  %v498_v12 = vmul.f32 1.442695, %v472_v6  ;;  %v941_v13 = vadd.f32 %v670_v7, %v914_v35 }
  0xf4   :  { %v944_v14 = vadd.f32 %v694_v8, %v914_v35  ;;  %v672_v15 = vpop.f32.mrf.mxu0  ;;  %v696_v16 = vpop.f32.mrf.mxu1 }
  0xf5   :  { %771 = vpow2.f32 %v482_v11  ;;  %v673_v17 = vadd.f32 %v672_v15, %v671_v9  ;;  %v697_v18 = vadd.f32 %v696_v16, %v695_v10  ;;  %v465_v19 = vmin.f32 %v941_v13, 0.0 }
  0xf6   :  { %773 = vpow2.f32 %v498_v12  ;;  %v674_v20 = vpop.f32.mrf.mxu0  ;;  %v698_v21 = vpop.f32.mrf.mxu1  ;;  %v473_v22 = vmin.f32 %v944_v14, 0.0  ;;  %vm449_vm6 = vcmp.gt.f32.partialorder %v941_v13, 0.0  ;;  %vm457_vm7 = vcmp.gt.f32.partialorder %v944_v14, 0.0 }
  0xf7   :  { %v949_v23 = vadd.f32 %v673_v17, %v914_v35  ;;  %v952_v24 = vadd.f32 %v697_v18, %v914_v35  ;;  %v484_v25 = vmul.f32 1.442695, %v465_v19 }
  0xf8   :  { %v675_v26 = vpop.f32.mrf.mxu0  ;;  %v699_v27 = vpop.f32.mrf.mxu1  ;;  %v500_v28 = vmul.f32 1.442695, %v473_v22 }
  0xf9   :  { %v466_v29 = vmin.f32 %v949_v23, 0.0  ;;  %775 = vpow2.f32 %v484_v25  ;;  %v474_v31 = vmin.f32 %v952_v24, 0.0  ;;  %v676_v32 = vadd.f32 %v675_v26, %v674_v20 }
  0xfa   :  { %v764_v30 = vpop.eup %763  ;;  %v700_v33 = vadd.f32 %v699_v27, %v698_v21  ;;  %v677_v34 = vpop.f32.mrf.mxu0  ;;  %777 = vpow2.f32 %v500_v28  ;;  %vm450_vm8 = vcmp.gt.f32.partialorder %v949_v23, 0.0  ;;  %vm458_vm9 = vcmp.gt.f32.partialorder %v952_v24, 0.0 }
  0xfb   :  { %v701_v36 = vpop.f32.mrf.mxu1  ;;  %v766_v37 = vpop.eup %765  ;;  %v627_v38 = vadd.f32 -1.0, %v764_v30  ;;  %v486_v39 = vmul.f32 1.442695, %v466_v29  ;;  %v502_v43 = vmul.f32 1.442695, %v474_v31  ;;  %v958_v44 = vadd.f32 %v676_v32, %v914_v35 }
  0xfc   :  { %v635_v40 = vadd.f32 -1.0, %v766_v37  ;;  %v961_v45 = vadd.f32 %v700_v33, %v914_v35  ;;  %v678_v46 = vpop.f32.mrf.mxu0 }
  0xfd   :  { %v702_v47 = vpop.f32.mrf.mxu1  ;;  %v526_v48 = vmul.f32 1.6732632, %v627_v38  ;;  %779 = vpow2.f32 %v486_v39  ;;  %v679_v49 = vadd.f32 %v678_v46, %v677_v34  ;;  %v467_v51 = vmin.f32 %v958_v44, 0.0 }
  0xfe   :  { %v534_v50 = vmul.f32 1.6732632, %v635_v40  ;;  %781 = vpow2.f32 %v502_v43  ;;  %v703_v52 = vadd.f32 %v702_v47, %v701_v36  ;;  %v680_v55 = vpop.f32.mrf.mxu0  ;;  %v768_v56 = vpop.eup %767  ;;  %v475_v58 = vmin.f32 %v961_v45, 0.0 }
  0xff   :  { %v542_v57 = vsel %vm446_vm0, %v917_v41, %v526_v48  ;;  %v971_v59 = vadd.f32 %v679_v49, %v914_v35  ;;  %v770_v60 = vpop.eup %769  ;;  %v628_v1 = vadd.f32 -1.0, %v768_v56  ;;  %v488_v2 = vmul.f32 1.442695, %v467_v51  ;;  %v704_v3 = vpop.f32.mrf.mxu1 }
 0x100   :  { %v558_v61 = vmul.f32 1.050701, %v542_v57  ;;  %v550_v62 = vsel %vm454_vm1, %v920_v42, %v534_v50  ;;  %v681_v4 = vpop.f32.mrf.mxu0  ;;  %v636_v41 = vadd.f32 -1.0, %v770_v60  ;;  %v504_v6 = vmul.f32 1.442695, %v475_v58 }
 0x101   :  { %v566_v5 = vmul.f32 1.050701, %v550_v62  ;;  %v527_v8 = vmul.f32 1.6732632, %v628_v1  ;;  %783 = vpow2.f32 %v488_v2  ;;  %v468_v9 = vmin.f32 %v971_v59, 0.0  ;;  %v705_v19 = vpop.f32.mrf.mxu1 }
 0x102   :  { %v772_v7 = vpop.eup %771  ;;  %574 = vst [vmem:[%s1071_s3] sm:$0xff] %v558_v61  ;;  %v982_v42 = vadd.f32 %v703_v52, %v914_v35  ;;  %v535_v11 = vmul.f32 1.6732632, %v636_v41  ;;  %785 = vpow2.f32 %v504_v6  ;;  %v682_v15 = vadd.f32 %v681_v4, %v680_v55 }
 0x103   :  { %v774_v10 = vpop.eup %773  ;;  %582 = vst [vmem:[%s1071_s3 + $0x40] sm:$0xff] %v566_v5  ;;  %v629_v12 = vadd.f32 -1.0, %v772_v7  ;;  %v543_v16 = vsel %vm447_vm2, %v925_v53, %v527_v8  ;;  %v490_v18 = vmul.f32 1.442695, %v468_v9  ;;  %vm451_vm10 = vcmp.gt.f32.partialorder %v958_v44, 0.0 }
 0x104   :  { %v637_v17 = vadd.f32 -1.0, %v774_v10  ;;  %v559_v20 = vmul.f32 1.050701, %v543_v16  ;;  %v551_v21 = vsel %vm455_vm3, %v928_v54, %v535_v11  ;;  %v476_v25 = vmin.f32 %v982_v42, 0.0 }
 0x105   :  { %v528_v22 = vmul.f32 1.6732632, %v629_v12  ;;  %v567_v26 = vmul.f32 1.050701, %v551_v21  ;;  %787 = vpow2.f32 %v490_v18  ;;  %v996_v28 = vadd.f32 %v682_v15, %v914_v35 }
 0x106   :  { %v536_v27 = vmul.f32 1.6732632, %v637_v17  ;;  %v776_v53 = vpop.eup %775  ;;  %575 = vst [vmem:[%s1071_s3 + $0x8] sm:$0xff] %v559_v20  ;;  %v506_v30 = vmul.f32 1.442695, %v476_v25  ;;  %v706_v54 = vadd.f32 %v705_v19, %v704_v3  ;;  %vm459_vm11 = vcmp.gt.f32.partialorder %v961_v45, 0.0 }
 0x107   :  { %v544_v29 = vsel %vm448_vm4, %v933_v63, %v528_v22  ;;  %v778_v31 = vpop.eup %777  ;;  %583 = vst [vmem:[%s1071_s3 + $0x48] sm:$0xff] %v567_v26  ;;  %v630_v34 = vadd.f32 -1.0, %v776_v53  ;;  %v469_v38 = vmin.f32 %v996_v28, 0.0  ;;  %vm452_vm12 = vcmp.gt.f32.partialorder %v971_v59, 0.0 }
 0x108   :  { %v560_v32 = vmul.f32 1.050701, %v544_v29  ;;  %v552_v33 = vsel %vm456_vm5, %v936_v0, %v536_v27  ;;  %v638_v37 = vadd.f32 -1.0, %v778_v31  ;;  %789 = vpow2.f32 %v506_v30 }
 0x109   :  { %v568_v36 = vmul.f32 1.050701, %v552_v33  ;;  %v529_v63 = vmul.f32 1.6732632, %v630_v34  ;;  %v1013_v40 = vadd.f32 %v706_v54, %v914_v35  ;;  %v492_v47 = vmul.f32 1.442695, %v469_v38 }
 0x10a   :  { %v780_v39 = vpop.eup %779  ;;  %576 = vst [vmem:[%s1071_s3 + $0x10] sm:$0xff] %v560_v32  ;;  %v537_v0 = vmul.f32 1.6732632, %v638_v37  ;;  %vm460_vm13 = vcmp.gt.f32.partialorder %v982_v42, 0.0  ;;  %vm453_vm14 = vcmp.gt.f32.partialorder %v996_v28, 0.0 }
 0x10b   :  { %v782_v43 = vpop.eup %781  ;;  %584 = vst [vmem:[%s1071_s3 + $0x50] sm:$0xff] %v568_v36  ;;  %v631_v46 = vadd.f32 -1.0, %v780_v39  ;;  %v545_v48 = vsel %vm449_vm6, %v941_v13, %v529_v63  ;;  %v477_v50 = vmin.f32 %v1013_v40, 0.0  ;;  %791 = vpow2.f32 %v492_v47 }
 0x10c   :  { %v639_v49 = vadd.f32 -1.0, %v782_v43  ;;  %v561_v51 = vmul.f32 1.050701, %v545_v48  ;;  %v553_v35 = vsel %vm457_vm7, %v944_v14, %v537_v0  ;;  %vm461_vm15 = vcmp.gt.f32.partialorder %v1013_v40, 0.0 }
 0x10d   :  { %v530_v52 = vmul.f32 1.6732632, %v631_v46  ;;  %v569_v55 = vmul.f32 1.050701, %v553_v35  ;;  %v508_v57 = vmul.f32 1.442695, %v477_v50 }
 0x10e   :  { %v538_v56 = vmul.f32 1.6732632, %v639_v49  ;;  %v784_v58 = vpop.eup %783  ;;  %577 = vst [vmem:[%s1071_s3 + $0x18] sm:$0xff] %v561_v51 }
 0x10f   :  { %v546_v13 = vsel %vm450_vm8, %v949_v23, %v530_v52  ;;  %v786_v60 = vpop.eup %785  ;;  %585 = vst [vmem:[%s1071_s3 + $0x58] sm:$0xff] %v569_v55  ;;  %v632_v62 = vadd.f32 -1.0, %v784_v58  ;;  %793 = vpow2.f32 %v508_v57 }
 0x110   :  { %v562_v14 = vmul.f32 1.050701, %v546_v13  ;;  %v554_v61 = vsel %vm458_vm9, %v952_v24, %v538_v56  ;;  %v640_v2 = vadd.f32 -1.0, %v786_v60 }
 0x111   :  { %v570_v1 = vmul.f32 1.050701, %v554_v61  ;;  %v531_v3 = vmul.f32 1.6732632, %v632_v62 }
 0x112   :  { %578 = vst [vmem:[%s1071_s3 + $0x20] sm:$0xff] %v562_v14  ;;  %v788_v23 = vpop.eup %787  ;;  %v539_v4 = vmul.f32 1.6732632, %v640_v2 }
 0x113   :  { %586 = vst [vmem:[%s1071_s3 + $0x60] sm:$0xff] %v570_v1  ;;  %v547_v5 = vsel %vm451_vm10, %v958_v44, %v531_v3  ;;  %v633_v24 = vadd.f32 -1.0, %v788_v23 }
 0x114   :  { %v563_v41 = vmul.f32 1.050701, %v547_v5  ;;  %v555_v6 = vsel %vm459_vm11, %v961_v45, %v539_v4 }
 0x115   :  { %v790_v7 = vpop.eup %789  ;;  %v571_v8 = vmul.f32 1.050701, %v555_v6  ;;  %v532_v9 = vmul.f32 1.6732632, %v633_v24 }
 0x116   :  { %579 = vst [vmem:[%s1071_s3 + $0x28] sm:$0xff] %v563_v41  ;;  %v641_v10 = vadd.f32 -1.0, %v790_v7 }
 0x117   :  { %587 = vst [vmem:[%s1071_s3 + $0x68] sm:$0xff] %v571_v8  ;;  %v548_v44 = vsel %vm452_vm12, %v971_v59, %v532_v9 }
 0x118   :  { %v564_v11 = vmul.f32 1.050701, %v548_v44  ;;  %v540_v12 = vmul.f32 1.6732632, %v641_v10  ;;  %v792_v15 = vpop.eup %791 }
 0x119   :  { %v634_v16 = vadd.f32 -1.0, %v792_v15 }
 0x11a   :  { %580 = vst [vmem:[%s1071_s3 + $0x30] sm:$0xff] %v564_v11  ;;  %v556_v45 = vsel %vm460_vm13, %v982_v42, %v540_v12 }
 0x11b   :  { %v572_v17 = vmul.f32 1.050701, %v556_v45  ;;  %v533_v19 = vmul.f32 1.6732632, %v634_v16 }
 0x11c   :  { %v794_v18 = vpop.eup %793 }
 0x11d   :  { %588 = vst [vmem:[%s1071_s3 + $0x70] sm:$0xff] %v572_v17  ;;  %v642_v59 = vadd.f32 -1.0, %v794_v18  ;;  %v549_v20 = vsel %vm453_vm14, %v996_v28, %v533_v19 }
 0x11e   :  { %v565_v21 = vmul.f32 1.050701, %v549_v20 }
 0x11f   :  { %v541_v22 = vmul.f32 1.6732632, %v642_v59 }
 0x120   :  { %581 = vst [vmem:[%s1071_s3 + $0x38] sm:$0xff] %v565_v21 }
 0x121   :  { %v557_v42 = vsel %vm461_vm15, %v1013_v40, %v541_v22 }
 0x122   :  { %v573_v25 = vmul.f32 1.050701, %v557_v42 }
 0x124   :  { %589 = vst [vmem:[%s1071_s3 + $0x78] sm:$0xff] %v573_v25 }

// kernel: mmd_net_d_forward.11
= control target key start
LH: loop header
LB: loop body
LE: loop exit
PB: predicated region body
PF: predicated region fallthrough
CT: control target
= control target key end

     0   :  { %s1900_s1 = inlined_call_operand.vmem [shape: bf16[128,128], index: 1, kind: input, shape index: {}]   ;;  %s1901_s0 = inlined_call_operand.vmem [shape: bf16[512,128], index: 0, kind: input, shape index: {}]   ;;  %s1902_s2 = inlined_call_operand.vmem [shape: f32[1,128], index: 2, kind: input, shape index: {}]   ;;  %s1903_s3 = inlined_call_operand.vmem [shape: f32[512,128], index: 3, kind: output, shape index: {}]  }
   0x1   :  { %v1331_v0 = vld [vmem:[%s1900_s1 + $0x38] sm:$0xff]   ;;  %v1332_v1 = vld [vmem:[%s1900_s1 + $0x30] sm:$0xff]   ;;  %v1333_v2 = vld [vmem:[%s1900_s1 + $0x28] sm:$0xff]  }
   0x2   :  { %1235 = vmatprep.subr.bf16.mxu0 %v1331_v0  ;;  %1315 = vmatprep.subr.bf16.mxu1 %v1331_v0  ;;  %v1334_v3 = vld [vmem:[%s1900_s1 + $0x20] sm:$0xff]   ;;  %v1335_v6 = vld [vmem:[%s1900_s1 + $0x18] sm:$0xff]   ;;  %v1336_v7 = vld [vmem:[%s1900_s1 + $0x10] sm:$0xff]  }
   0x3   :  { %1236 = vmatpush3.bf16.msra.mxu0 %v1331_v0  ;;  %1323 = vmatpush3.bf16.msra.mxu1 %v1331_v0  ;;  %v1339_v4 = vld [vmem:[%s1901_s0] sm:$0xff]   ;;  %v1337_v8 = vld [vmem:[%s1900_s1 + $0x8] sm:$0xff]   ;;  %v1343_v12 = vld [vmem:[%s1901_s0 + $0x10] sm:$0xff]  }
   0x4   :  { %1237 = vmatprep.subr.bf16.mxu0 %v1332_v1  ;;  %1316 = vmatprep.subr.bf16.mxu1 %v1332_v1  ;;  %v1340_v5 = vld [vmem:[%s1901_s0 + $0x80] sm:$0xff]   ;;  %v1341_v10 = vld [vmem:[%s1901_s0 + $0x8] sm:$0xff]   ;;  %v1344_v13 = vld [vmem:[%s1901_s0 + $0x90] sm:$0xff]  }
   0x5   :  { %1251 = vmatprep.mubr.bf16.mxu0 %v1339_v4  ;;  %1283 = vmatprep.mubr.bf16.mxu1 %v1340_v5  ;;  %v1338_v9 = vld [vmem:[%s1900_s1] sm:$0xff]   ;;  %v1342_v11 = vld [vmem:[%s1901_s0 + $0x88] sm:$0xff]   ;;  %v1345_v14 = vld [vmem:[%s1901_s0 + $0x18] sm:$0xff]  }
   0x6   :  { %v1346_v15 = vld [vmem:[%s1901_s0 + $0x98] sm:$0xff]   ;;  %v1347_v16 = vld [vmem:[%s1901_s0 + $0x20] sm:$0xff]   ;;  %v1349_v18 = vld [vmem:[%s1901_s0 + $0x28] sm:$0xff]  }
   0x7   :  { %1238 = vmatpush3.bf16.msra.mxu0 %v1332_v1  ;;  %1324 = vmatpush3.bf16.msra.mxu1 %v1332_v1  ;;  %v1348_v17 = vld [vmem:[%s1901_s0 + $0xa0] sm:$0xff]   ;;  %v1350_v19 = vld [vmem:[%s1901_s0 + $0xa8] sm:$0xff]   ;;  %v1351_v20 = vld [vmem:[%s1901_s0 + $0x30] sm:$0xff]  }
   0x8   :  { %1239 = vmatprep.subr.bf16.mxu0 %v1333_v2  ;;  %1317 = vmatprep.subr.bf16.mxu1 %v1333_v2  ;;  %v1352_v21 = vld [vmem:[%s1901_s0 + $0xb0] sm:$0xff]   ;;  %v1353_v22 = vld [vmem:[%s1901_s0 + $0x38] sm:$0xff]   ;;  %v1355_v24 = vld [vmem:[%s1901_s0 + $0x40] sm:$0xff]  }
   0x9   :  { %v1354_v23 = vld [vmem:[%s1901_s0 + $0xb8] sm:$0xff]   ;;  %v1356_v25 = vld [vmem:[%s1901_s0 + $0xc0] sm:$0xff]   ;;  %v1357_v26 = vld [vmem:[%s1901_s0 + $0x48] sm:$0xff]  }
   0xa   :  { %v1358_v27 = vld [vmem:[%s1901_s0 + $0xc8] sm:$0xff]   ;;  %v1359_v28 = vld [vmem:[%s1901_s0 + $0x50] sm:$0xff]   ;;  %v1361_v30 = vld [vmem:[%s1901_s0 + $0x58] sm:$0xff]  }
   0xb   :  { %1240 = vmatpush3.bf16.msra.mxu0 %v1333_v2  ;;  %1325 = vmatpush3.bf16.msra.mxu1 %v1333_v2  ;;  %v1360_v29 = vld [vmem:[%s1901_s0 + $0xd0] sm:$0xff]   ;;  %v1362_v31 = vld [vmem:[%s1901_s0 + $0xd8] sm:$0xff]   ;;  %v1363_v32 = vld [vmem:[%s1901_s0 + $0x60] sm:$0xff]  }
   0xc   :  { %1241 = vmatprep.subr.bf16.mxu0 %v1334_v3  ;;  %1318 = vmatprep.subr.bf16.mxu1 %v1334_v3  ;;  %v1364_v33 = vld [vmem:[%s1901_s0 + $0xe0] sm:$0xff]   ;;  %v1365_v34 = vld [vmem:[%s1901_s0 + $0x68] sm:$0xff]   ;;  %v1367_v36 = vld [vmem:[%s1901_s0 + $0x70] sm:$0xff]  }
   0xd   :  { %v1366_v35 = vld [vmem:[%s1901_s0 + $0xe8] sm:$0xff]   ;;  %v1368_v37 = vld [vmem:[%s1901_s0 + $0xf0] sm:$0xff]   ;;  %v1369_v38 = vld [vmem:[%s1901_s0 + $0x78] sm:$0xff]  }
   0xe   :  { %v1370_v39 = vld [vmem:[%s1901_s0 + $0xf8] sm:$0xff]   ;;  %v1642_v40 = vld [vmem:[%s1902_s2] ss:$0 sm:$0xff] }
   0xf   :  { %1242 = vmatpush3.bf16.msra.mxu0 %v1334_v3  ;;  %1326 = vmatpush3.bf16.msra.mxu1 %v1334_v3 }
  0x10   :  { %1243 = vmatprep.subr.bf16.mxu0 %v1335_v6  ;;  %1319 = vmatprep.subr.bf16.mxu1 %v1335_v6 }
  0x13   :  { %1244 = vmatpush3.bf16.msra.mxu0 %v1335_v6  ;;  %1327 = vmatpush3.bf16.msra.mxu1 %v1335_v6 }
  0x14   :  { %1245 = vmatprep.subr.bf16.mxu0 %v1336_v7  ;;  %1320 = vmatprep.subr.bf16.mxu1 %v1336_v7 }
  0x17   :  { %1246 = vmatpush3.bf16.msra.mxu0 %v1336_v7  ;;  %1328 = vmatpush3.bf16.msra.mxu1 %v1336_v7 }
  0x18   :  { %1247 = vmatprep.subr.bf16.mxu0 %v1337_v8  ;;  %1321 = vmatprep.subr.bf16.mxu1 %v1337_v8 }
  0x1b   :  { %1248 = vmatpush3.bf16.msra.mxu0 %v1337_v8  ;;  %1329 = vmatpush3.bf16.msra.mxu1 %v1337_v8 }
  0x1c   :  { %1249 = vmatprep.subr.bf16.mxu0 %v1338_v9  ;;  %1322 = vmatprep.subr.bf16.mxu1 %v1338_v9 }
  0x1f   :  { %1250 = vmatpush3.bf16.msra.mxu0 %v1338_v9  ;;  %1330 = vmatpush3.bf16.msra.mxu1 %v1338_v9 }
  0x22   :  { %1252 = vmatmul.mubr.bf16.vlgmr.msra.gmra.mxu0 %v1341_v10  ;;  %1284 = vmatmul.mubr.bf16.vlgmr.msra.gmra.mxu1 %v1342_v11 }
  0x23   :  { %1255 = vmatprep.mubr.bf16.mxu0 %v1343_v12  ;;  %1287 = vmatprep.mubr.bf16.mxu1 %v1344_v13 }
  0x2a   :  { %1256 = vmatmul.mubr.bf16.gmra.mxu0 %v1345_v14  ;;  %1288 = vmatmul.mubr.bf16.gmra.mxu1 %v1346_v15 }
  0x2b   :  { %1259 = vmatprep.mubr.bf16.mxu0 %v1347_v16  ;;  %1291 = vmatprep.mubr.bf16.mxu1 %v1348_v17 }
  0x32   :  { %1260 = vmatmul.mubr.bf16.gmra.mxu0 %v1349_v18  ;;  %1292 = vmatmul.mubr.bf16.gmra.mxu1 %v1350_v19 }
  0x33   :  { %1263 = vmatprep.mubr.bf16.mxu0 %v1351_v20  ;;  %1295 = vmatprep.mubr.bf16.mxu1 %v1352_v21 }
  0x3a   :  { %1264 = vmatmul.mubr.bf16.gmra.mxu0 %v1353_v22  ;;  %1296 = vmatmul.mubr.bf16.gmra.mxu1 %v1354_v23 }
  0x3b   :  { %1267 = vmatprep.mubr.bf16.mxu0 %v1355_v24  ;;  %1299 = vmatprep.mubr.bf16.mxu1 %v1356_v25 }
  0x42   :  { %1268 = vmatmul.mubr.bf16.gmra.mxu0 %v1357_v26  ;;  %1300 = vmatmul.mubr.bf16.gmra.mxu1 %v1358_v27 }
  0x43   :  { %1271 = vmatprep.mubr.bf16.mxu0 %v1359_v28  ;;  %1303 = vmatprep.mubr.bf16.mxu1 %v1360_v29 }
  0x4a   :  { %1272 = vmatmul.mubr.bf16.gmra.mxu0 %v1361_v30  ;;  %1304 = vmatmul.mubr.bf16.gmra.mxu1 %v1362_v31 }
  0x4b   :  { %1275 = vmatprep.mubr.bf16.mxu0 %v1363_v32  ;;  %1307 = vmatprep.mubr.bf16.mxu1 %v1364_v33 }
  0x52   :  { %1276 = vmatmul.mubr.bf16.gmra.mxu0 %v1365_v34  ;;  %1308 = vmatmul.mubr.bf16.gmra.mxu1 %v1366_v35 }
  0x53   :  { %1279 = vmatprep.mubr.bf16.mxu0 %v1367_v36  ;;  %1311 = vmatprep.mubr.bf16.mxu1 %v1368_v37 }
  0x5a   :  { %1280 = vmatmul.mubr.bf16.gmra.mxu0 %v1369_v38  ;;  %1312 = vmatmul.mubr.bf16.gmra.mxu1 %v1370_v39 }
  0xe2   :  { %v1253_v41 = vpop.f32.mrf.mxu0  ;;  %v1285_v42 = vpop.f32.mrf.mxu1 }
  0xe3   :  { %v960_v43 = vadd.f32 %v1253_v41, %v1642_v40  ;;  %v992_v44 = vadd.f32 %v1285_v42, %v1642_v40 }
  0xe4   :  { %v501_v45 = vpop.f32.mrf.mxu0  ;;  %v629_v46 = vpop.f32.mrf.mxu1 }
  0xe5   :  { %1371 = vtanh.f32 %v960_v43  ;;  %v958_v47 = vadd.f32 %v1642_v40, %v501_v45  ;;  %v990_v48 = vadd.f32 %v1642_v40, %v629_v46 }
  0xe6   :  { %1373 = vtanh.f32 %v992_v44  ;;  %v1254_v49 = vpop.f32.mrf.mxu0  ;;  %v1286_v50 = vpop.f32.mrf.mxu1 }
  0xe7   :  { %1375 = vtanh.f32 %v958_v47  ;;  %v961_v51 = vadd.f32 %v1254_v49, %v1642_v40  ;;  %v993_v52 = vadd.f32 %v1286_v50, %v1642_v40 }
  0xe8   :  { %1377 = vtanh.f32 %v990_v48  ;;  %v504_v53 = vpop.f32.mrf.mxu0  ;;  %v632_v54 = vpop.f32.mrf.mxu1 }
  0xe9   :  { %1379 = vtanh.f32 %v961_v51  ;;  %v959_v55 = vadd.f32 %v1642_v40, %v504_v53  ;;  %v991_v56 = vadd.f32 %v1642_v40, %v632_v54 }
  0xea   :  { %1381 = vtanh.f32 %v993_v52  ;;  %v1257_v57 = vpop.f32.mrf.mxu0  ;;  %v1289_v58 = vpop.f32.mrf.mxu1 }
  0xeb   :  { %1383 = vtanh.f32 %v959_v55  ;;  %v964_v59 = vadd.f32 %v1257_v57, %v1642_v40  ;;  %v996_v60 = vadd.f32 %v1289_v58, %v1642_v40 }
  0xec   :  { %1385 = vtanh.f32 %v991_v56  ;;  %v517_v61 = vpop.f32.mrf.mxu0  ;;  %v645_v62 = vpop.f32.mrf.mxu1 }
  0xed   :  { %1387 = vtanh.f32 %v964_v59  ;;  %v962_v63 = vadd.f32 %v1642_v40, %v517_v61  ;;  %v994_v0 = vadd.f32 %v1642_v40, %v645_v62 }
  0xee   :  { %1389 = vtanh.f32 %v996_v60  ;;  %v1258_v1 = vpop.f32.mrf.mxu0  ;;  %v1290_v2 = vpop.f32.mrf.mxu1 }
  0xef   :  { %1391 = vtanh.f32 %v962_v63  ;;  %v965_v3 = vadd.f32 %v1258_v1, %v1642_v40  ;;  %v997_v4 = vadd.f32 %v1290_v2, %v1642_v40 }
  0xf0   :  { %1393 = vtanh.f32 %v994_v0  ;;  %v520_v5 = vpop.f32.mrf.mxu0  ;;  %v648_v6 = vpop.f32.mrf.mxu1 }
  0xf1   :  { %1395 = vtanh.f32 %v965_v3  ;;  %v963_v7 = vadd.f32 %v1642_v40, %v520_v5  ;;  %v995_v8 = vadd.f32 %v1642_v40, %v648_v6 }
  0xf2   :  { %v1372_v9 = vpop.eup %1371  ;;  %1397 = vtanh.f32 %v997_v4  ;;  %v1261_v10 = vpop.f32.mrf.mxu0 }
  0xf3   :  { %v1293_v11 = vpop.f32.mrf.mxu1  ;;  %v1374_v12 = vpop.eup %1373  ;;  %1088 = vst [vmem:[%s1903_s3 + $0x10] sm:$0xff] %v1372_v9  ;;  %1399 = vtanh.f32 %v963_v7  ;;  %v968_v13 = vadd.f32 %v1261_v10, %v1642_v40 }
  0xf4   :  { %v1000_v14 = vadd.f32 %v1293_v11, %v1642_v40  ;;  %v1376_v15 = vpop.eup %1375  ;;  %1120 = vst [vmem:[%s1903_s3 + $0x110] sm:$0xff] %v1374_v12  ;;  %1401 = vtanh.f32 %v995_v8  ;;  %v533_v16 = vpop.f32.mrf.mxu0 }
  0xf5   :  { %v661_v17 = vpop.f32.mrf.mxu1  ;;  %v1378_v18 = vpop.eup %1377  ;;  %1086 = vst [vmem:[%s1903_s3] sm:$0xff] %v1376_v15  ;;  %1403 = vtanh.f32 %v968_v13  ;;  %v966_v19 = vadd.f32 %v1642_v40, %v533_v16 }
  0xf6   :  { %v998_v20 = vadd.f32 %v1642_v40, %v661_v17  ;;  %v1380_v21 = vpop.eup %1379  ;;  %1118 = vst [vmem:[%s1903_s3 + $0x100] sm:$0xff] %v1378_v18  ;;  %1405 = vtanh.f32 %v1000_v14  ;;  %v1262_v22 = vpop.f32.mrf.mxu0 }
  0xf7   :  { %v1294_v23 = vpop.f32.mrf.mxu1  ;;  %v1382_v24 = vpop.eup %1381  ;;  %1089 = vst [vmem:[%s1903_s3 + $0x18] sm:$0xff] %v1380_v21  ;;  %1407 = vtanh.f32 %v966_v19  ;;  %v969_v25 = vadd.f32 %v1262_v22, %v1642_v40 }
  0xf8   :  { %v1001_v26 = vadd.f32 %v1294_v23, %v1642_v40  ;;  %v1384_v27 = vpop.eup %1383  ;;  %1121 = vst [vmem:[%s1903_s3 + $0x118] sm:$0xff] %v1382_v24  ;;  %1409 = vtanh.f32 %v998_v20  ;;  %v536_v28 = vpop.f32.mrf.mxu0 }
  0xf9   :  { %v664_v29 = vpop.f32.mrf.mxu1  ;;  %v1386_v30 = vpop.eup %1385  ;;  %1087 = vst [vmem:[%s1903_s3 + $0x8] sm:$0xff] %v1384_v27  ;;  %1411 = vtanh.f32 %v969_v25  ;;  %v967_v31 = vadd.f32 %v1642_v40, %v536_v28 }
  0xfa   :  { %v999_v32 = vadd.f32 %v1642_v40, %v664_v29  ;;  %v1388_v33 = vpop.eup %1387  ;;  %1119 = vst [vmem:[%s1903_s3 + $0x108] sm:$0xff] %v1386_v30  ;;  %1413 = vtanh.f32 %v1001_v26  ;;  %v1265_v34 = vpop.f32.mrf.mxu0 }
  0xfb   :  { %v1297_v35 = vpop.f32.mrf.mxu1  ;;  %v1390_v36 = vpop.eup %1389  ;;  %1092 = vst [vmem:[%s1903_s3 + $0x30] sm:$0xff] %v1388_v33  ;;  %1415 = vtanh.f32 %v967_v31  ;;  %v972_v37 = vadd.f32 %v1265_v34, %v1642_v40 }
  0xfc   :  { %v1004_v38 = vadd.f32 %v1297_v35, %v1642_v40  ;;  %v1392_v39 = vpop.eup %1391  ;;  %1124 = vst [vmem:[%s1903_s3 + $0x130] sm:$0xff] %v1390_v36  ;;  %1417 = vtanh.f32 %v999_v32  ;;  %v549_v41 = vpop.f32.mrf.mxu0 }
  0xfd   :  { %v677_v42 = vpop.f32.mrf.mxu1  ;;  %v1394_v43 = vpop.eup %1393  ;;  %1090 = vst [vmem:[%s1903_s3 + $0x20] sm:$0xff] %v1392_v39  ;;  %1419 = vtanh.f32 %v972_v37  ;;  %v970_v44 = vadd.f32 %v1642_v40, %v549_v41 }
  0xfe   :  { %v1002_v45 = vadd.f32 %v1642_v40, %v677_v42  ;;  %v1396_v46 = vpop.eup %1395  ;;  %1122 = vst [vmem:[%s1903_s3 + $0x120] sm:$0xff] %v1394_v43  ;;  %1421 = vtanh.f32 %v1004_v38  ;;  %v1266_v47 = vpop.f32.mrf.mxu0 }
  0xff   :  { %v1298_v48 = vpop.f32.mrf.mxu1  ;;  %v1398_v49 = vpop.eup %1397  ;;  %1093 = vst [vmem:[%s1903_s3 + $0x38] sm:$0xff] %v1396_v46  ;;  %1423 = vtanh.f32 %v970_v44  ;;  %v973_v50 = vadd.f32 %v1266_v47, %v1642_v40 }
 0x100   :  { %v1005_v51 = vadd.f32 %v1298_v48, %v1642_v40  ;;  %v1400_v52 = vpop.eup %1399  ;;  %1125 = vst [vmem:[%s1903_s3 + $0x138] sm:$0xff] %v1398_v49  ;;  %1425 = vtanh.f32 %v1002_v45  ;;  %v552_v53 = vpop.f32.mrf.mxu0 }
 0x101   :  { %v680_v54 = vpop.f32.mrf.mxu1  ;;  %v1402_v55 = vpop.eup %1401  ;;  %1091 = vst [vmem:[%s1903_s3 + $0x28] sm:$0xff] %v1400_v52  ;;  %1427 = vtanh.f32 %v973_v50  ;;  %v971_v56 = vadd.f32 %v1642_v40, %v552_v53 }
 0x102   :  { %v1003_v57 = vadd.f32 %v1642_v40, %v680_v54  ;;  %v1404_v58 = vpop.eup %1403  ;;  %1123 = vst [vmem:[%s1903_s3 + $0x128] sm:$0xff] %v1402_v55  ;;  %1429 = vtanh.f32 %v1005_v51  ;;  %v1269_v59 = vpop.f32.mrf.mxu0 }
 0x103   :  { %v1301_v60 = vpop.f32.mrf.mxu1  ;;  %v1406_v61 = vpop.eup %1405  ;;  %1096 = vst [vmem:[%s1903_s3 + $0x50] sm:$0xff] %v1404_v58  ;;  %1431 = vtanh.f32 %v971_v56  ;;  %v976_v62 = vadd.f32 %v1269_v59, %v1642_v40 }
 0x104   :  { %v1008_v63 = vadd.f32 %v1301_v60, %v1642_v40  ;;  %v1408_v0 = vpop.eup %1407  ;;  %1128 = vst [vmem:[%s1903_s3 + $0x150] sm:$0xff] %v1406_v61  ;;  %1433 = vtanh.f32 %v1003_v57  ;;  %v565_v1 = vpop.f32.mrf.mxu0 }
 0x105   :  { %v693_v2 = vpop.f32.mrf.mxu1  ;;  %v1410_v3 = vpop.eup %1409  ;;  %1094 = vst [vmem:[%s1903_s3 + $0x40] sm:$0xff] %v1408_v0  ;;  %1435 = vtanh.f32 %v976_v62  ;;  %v974_v4 = vadd.f32 %v1642_v40, %v565_v1 }
 0x106   :  { %v1006_v5 = vadd.f32 %v1642_v40, %v693_v2  ;;  %v1412_v6 = vpop.eup %1411  ;;  %1126 = vst [vmem:[%s1903_s3 + $0x140] sm:$0xff] %v1410_v3  ;;  %1437 = vtanh.f32 %v1008_v63  ;;  %v1270_v7 = vpop.f32.mrf.mxu0 }
 0x107   :  { %v1302_v8 = vpop.f32.mrf.mxu1  ;;  %v1414_v9 = vpop.eup %1413  ;;  %1097 = vst [vmem:[%s1903_s3 + $0x58] sm:$0xff] %v1412_v6  ;;  %1439 = vtanh.f32 %v974_v4  ;;  %v977_v10 = vadd.f32 %v1270_v7, %v1642_v40 }
 0x108   :  { %v1009_v11 = vadd.f32 %v1302_v8, %v1642_v40  ;;  %v1416_v12 = vpop.eup %1415  ;;  %1129 = vst [vmem:[%s1903_s3 + $0x158] sm:$0xff] %v1414_v9  ;;  %1441 = vtanh.f32 %v1006_v5  ;;  %v568_v13 = vpop.f32.mrf.mxu0 }
 0x109   :  { %v696_v14 = vpop.f32.mrf.mxu1  ;;  %v1418_v15 = vpop.eup %1417  ;;  %1095 = vst [vmem:[%s1903_s3 + $0x48] sm:$0xff] %v1416_v12  ;;  %1443 = vtanh.f32 %v977_v10  ;;  %v975_v16 = vadd.f32 %v1642_v40, %v568_v13 }
 0x10a   :  { %v1007_v17 = vadd.f32 %v1642_v40, %v696_v14  ;;  %v1420_v18 = vpop.eup %1419  ;;  %1127 = vst [vmem:[%s1903_s3 + $0x148] sm:$0xff] %v1418_v15  ;;  %1445 = vtanh.f32 %v1009_v11  ;;  %v1273_v19 = vpop.f32.mrf.mxu0 }
 0x10b   :  { %v1305_v20 = vpop.f32.mrf.mxu1  ;;  %v1422_v21 = vpop.eup %1421  ;;  %1100 = vst [vmem:[%s1903_s3 + $0x70] sm:$0xff] %v1420_v18  ;;  %1447 = vtanh.f32 %v975_v16  ;;  %v980_v22 = vadd.f32 %v1273_v19, %v1642_v40 }
 0x10c   :  { %v1012_v23 = vadd.f32 %v1305_v20, %v1642_v40  ;;  %v1424_v24 = vpop.eup %1423  ;;  %1132 = vst [vmem:[%s1903_s3 + $0x170] sm:$0xff] %v1422_v21  ;;  %1449 = vtanh.f32 %v1007_v17  ;;  %v581_v25 = vpop.f32.mrf.mxu0 }
 0x10d   :  { %v709_v26 = vpop.f32.mrf.mxu1  ;;  %v1426_v27 = vpop.eup %1425  ;;  %1098 = vst [vmem:[%s1903_s3 + $0x60] sm:$0xff] %v1424_v24  ;;  %1451 = vtanh.f32 %v980_v22  ;;  %v978_v28 = vadd.f32 %v1642_v40, %v581_v25 }
 0x10e   :  { %v1010_v29 = vadd.f32 %v1642_v40, %v709_v26  ;;  %v1428_v30 = vpop.eup %1427  ;;  %1130 = vst [vmem:[%s1903_s3 + $0x160] sm:$0xff] %v1426_v27  ;;  %1453 = vtanh.f32 %v1012_v23  ;;  %v1274_v31 = vpop.f32.mrf.mxu0 }
 0x10f   :  { %v1306_v32 = vpop.f32.mrf.mxu1  ;;  %v1430_v33 = vpop.eup %1429  ;;  %1101 = vst [vmem:[%s1903_s3 + $0x78] sm:$0xff] %v1428_v30  ;;  %1455 = vtanh.f32 %v978_v28  ;;  %v981_v34 = vadd.f32 %v1274_v31, %v1642_v40 }
 0x110   :  { %v1013_v35 = vadd.f32 %v1306_v32, %v1642_v40  ;;  %v1432_v36 = vpop.eup %1431  ;;  %1133 = vst [vmem:[%s1903_s3 + $0x178] sm:$0xff] %v1430_v33  ;;  %1457 = vtanh.f32 %v1010_v29  ;;  %v584_v37 = vpop.f32.mrf.mxu0 }
 0x111   :  { %v712_v38 = vpop.f32.mrf.mxu1  ;;  %v1434_v39 = vpop.eup %1433  ;;  %1099 = vst [vmem:[%s1903_s3 + $0x68] sm:$0xff] %v1432_v36  ;;  %1459 = vtanh.f32 %v981_v34  ;;  %v979_v41 = vadd.f32 %v1642_v40, %v584_v37 }
 0x112   :  { %v1011_v42 = vadd.f32 %v1642_v40, %v712_v38  ;;  %v1436_v43 = vpop.eup %1435  ;;  %1131 = vst [vmem:[%s1903_s3 + $0x168] sm:$0xff] %v1434_v39  ;;  %1461 = vtanh.f32 %v1013_v35  ;;  %v1277_v44 = vpop.f32.mrf.mxu0 }
 0x113   :  { %v1309_v45 = vpop.f32.mrf.mxu1  ;;  %v1438_v46 = vpop.eup %1437  ;;  %1104 = vst [vmem:[%s1903_s3 + $0x90] sm:$0xff] %v1436_v43  ;;  %1463 = vtanh.f32 %v979_v41  ;;  %v984_v47 = vadd.f32 %v1277_v44, %v1642_v40 }
 0x114   :  { %v1016_v48 = vadd.f32 %v1309_v45, %v1642_v40  ;;  %v1440_v49 = vpop.eup %1439  ;;  %1136 = vst [vmem:[%s1903_s3 + $0x190] sm:$0xff] %v1438_v46  ;;  %1465 = vtanh.f32 %v1011_v42  ;;  %v597_v50 = vpop.f32.mrf.mxu0 }
 0x115   :  { %v725_v51 = vpop.f32.mrf.mxu1  ;;  %v1442_v52 = vpop.eup %1441  ;;  %1102 = vst [vmem:[%s1903_s3 + $0x80] sm:$0xff] %v1440_v49  ;;  %1467 = vtanh.f32 %v984_v47  ;;  %v982_v53 = vadd.f32 %v1642_v40, %v597_v50 }
 0x116   :  { %v1014_v54 = vadd.f32 %v1642_v40, %v725_v51  ;;  %v1444_v55 = vpop.eup %1443  ;;  %1134 = vst [vmem:[%s1903_s3 + $0x180] sm:$0xff] %v1442_v52  ;;  %1469 = vtanh.f32 %v1016_v48  ;;  %v1278_v56 = vpop.f32.mrf.mxu0 }
 0x117   :  { %v1310_v57 = vpop.f32.mrf.mxu1  ;;  %v1446_v58 = vpop.eup %1445  ;;  %1105 = vst [vmem:[%s1903_s3 + $0x98] sm:$0xff] %v1444_v55  ;;  %1471 = vtanh.f32 %v982_v53  ;;  %v985_v59 = vadd.f32 %v1278_v56, %v1642_v40 }
 0x118   :  { %v1017_v60 = vadd.f32 %v1310_v57, %v1642_v40  ;;  %v1448_v61 = vpop.eup %1447  ;;  %1137 = vst [vmem:[%s1903_s3 + $0x198] sm:$0xff] %v1446_v58  ;;  %1473 = vtanh.f32 %v1014_v54  ;;  %v600_v62 = vpop.f32.mrf.mxu0 }
 0x119   :  { %v728_v63 = vpop.f32.mrf.mxu1  ;;  %v1450_v0 = vpop.eup %1449  ;;  %1103 = vst [vmem:[%s1903_s3 + $0x88] sm:$0xff] %v1448_v61  ;;  %1475 = vtanh.f32 %v985_v59  ;;  %v983_v1 = vadd.f32 %v1642_v40, %v600_v62 }
 0x11a   :  { %v1015_v2 = vadd.f32 %v1642_v40, %v728_v63  ;;  %v1452_v3 = vpop.eup %1451  ;;  %1135 = vst [vmem:[%s1903_s3 + $0x188] sm:$0xff] %v1450_v0  ;;  %1477 = vtanh.f32 %v1017_v60  ;;  %v1281_v4 = vpop.f32.mrf.mxu0 }
 0x11b   :  { %v1313_v5 = vpop.f32.mrf.mxu1  ;;  %v1454_v6 = vpop.eup %1453  ;;  %1108 = vst [vmem:[%s1903_s3 + $0xb0] sm:$0xff] %v1452_v3  ;;  %1479 = vtanh.f32 %v983_v1  ;;  %v988_v7 = vadd.f32 %v1281_v4, %v1642_v40 }
 0x11c   :  { %v1020_v8 = vadd.f32 %v1313_v5, %v1642_v40  ;;  %v1456_v9 = vpop.eup %1455  ;;  %1140 = vst [vmem:[%s1903_s3 + $0x1b0] sm:$0xff] %v1454_v6  ;;  %1481 = vtanh.f32 %v1015_v2  ;;  %v613_v10 = vpop.f32.mrf.mxu0 }
 0x11d   :  { %v741_v11 = vpop.f32.mrf.mxu1  ;;  %v1458_v12 = vpop.eup %1457  ;;  %1106 = vst [vmem:[%s1903_s3 + $0xa0] sm:$0xff] %v1456_v9  ;;  %1483 = vtanh.f32 %v988_v7  ;;  %v986_v13 = vadd.f32 %v1642_v40, %v613_v10 }
 0x11e   :  { %v1018_v14 = vadd.f32 %v1642_v40, %v741_v11  ;;  %v1460_v15 = vpop.eup %1459  ;;  %1138 = vst [vmem:[%s1903_s3 + $0x1a0] sm:$0xff] %v1458_v12  ;;  %1485 = vtanh.f32 %v1020_v8  ;;  %v1282_v16 = vpop.f32.mrf.mxu0 }
 0x11f   :  { %v1314_v17 = vpop.f32.mrf.mxu1  ;;  %v1462_v18 = vpop.eup %1461  ;;  %1109 = vst [vmem:[%s1903_s3 + $0xb8] sm:$0xff] %v1460_v15  ;;  %1487 = vtanh.f32 %v986_v13  ;;  %v989_v19 = vadd.f32 %v1282_v16, %v1642_v40 }
 0x120   :  { %v1021_v20 = vadd.f32 %v1314_v17, %v1642_v40  ;;  %v1464_v21 = vpop.eup %1463  ;;  %1141 = vst [vmem:[%s1903_s3 + $0x1b8] sm:$0xff] %v1462_v18  ;;  %1489 = vtanh.f32 %v1018_v14  ;;  %v616_v22 = vpop.f32.mrf.mxu0 }
 0x121   :  { %v744_v23 = vpop.f32.mrf.mxu1  ;;  %v1466_v24 = vpop.eup %1465  ;;  %1107 = vst [vmem:[%s1903_s3 + $0xa8] sm:$0xff] %v1464_v21  ;;  %1491 = vtanh.f32 %v989_v19  ;;  %v987_v25 = vadd.f32 %v1642_v40, %v616_v22 }
 0x122   :  { %v1019_v26 = vadd.f32 %v1642_v40, %v744_v23  ;;  %v1468_v27 = vpop.eup %1467  ;;  %1139 = vst [vmem:[%s1903_s3 + $0x1a8] sm:$0xff] %v1466_v24  ;;  %1493 = vtanh.f32 %v1021_v20 }
 0x123   :  { %v1470_v28 = vpop.eup %1469  ;;  %1112 = vst [vmem:[%s1903_s3 + $0xd0] sm:$0xff] %v1468_v27  ;;  %1495 = vtanh.f32 %v987_v25 }
 0x124   :  { %v1472_v29 = vpop.eup %1471  ;;  %1144 = vst [vmem:[%s1903_s3 + $0x1d0] sm:$0xff] %v1470_v28  ;;  %1497 = vtanh.f32 %v1019_v26 }
 0x125   :  { %v1474_v30 = vpop.eup %1473  ;;  %1110 = vst [vmem:[%s1903_s3 + $0xc0] sm:$0xff] %v1472_v29 }
 0x126   :  { %v1476_v40 = vpop.eup %1475  ;;  %1142 = vst [vmem:[%s1903_s3 + $0x1c0] sm:$0xff] %v1474_v30 }
 0x127   :  { %v1478_v31 = vpop.eup %1477  ;;  %1113 = vst [vmem:[%s1903_s3 + $0xd8] sm:$0xff] %v1476_v40 }
 0x128   :  { %v1480_v32 = vpop.eup %1479  ;;  %1145 = vst [vmem:[%s1903_s3 + $0x1d8] sm:$0xff] %v1478_v31 }
 0x129   :  { %v1482_v33 = vpop.eup %1481  ;;  %1111 = vst [vmem:[%s1903_s3 + $0xc8] sm:$0xff] %v1480_v32 }
 0x12a   :  { %v1484_v34 = vpop.eup %1483  ;;  %1143 = vst [vmem:[%s1903_s3 + $0x1c8] sm:$0xff] %v1482_v33 }
 0x12b   :  { %v1486_v35 = vpop.eup %1485  ;;  %1116 = vst [vmem:[%s1903_s3 + $0xf0] sm:$0xff] %v1484_v34 }
 0x12c   :  { %v1488_v36 = vpop.eup %1487  ;;  %1148 = vst [vmem:[%s1903_s3 + $0x1f0] sm:$0xff] %v1486_v35 }
 0x12d   :  { %v1490_v37 = vpop.eup %1489  ;;  %1114 = vst [vmem:[%s1903_s3 + $0xe0] sm:$0xff] %v1488_v36 }
 0x12e   :  { %v1492_v38 = vpop.eup %1491  ;;  %1146 = vst [vmem:[%s1903_s3 + $0x1e0] sm:$0xff] %v1490_v37 }
 0x12f   :  { %v1494_v39 = vpop.eup %1493  ;;  %1117 = vst [vmem:[%s1903_s3 + $0xf8] sm:$0xff] %v1492_v38 }
 0x130   :  { %v1496_v41 = vpop.eup %1495  ;;  %1149 = vst [vmem:[%s1903_s3 + $0x1f8] sm:$0xff] %v1494_v39 }
 0x131   :  { %v1498_v42 = vpop.eup %1497  ;;  %1115 = vst [vmem:[%s1903_s3 + $0xe8] sm:$0xff] %v1496_v41 }
 0x132   :  { %1147 = vst [vmem:[%s1903_s3 + $0x1e8] sm:$0xff] %v1498_v42 }

</bundles_post_ra>
